<compile_context>
chip_gen: v7x
topology: tpu7x:2x2x1
jax: 0.10.0
libtpu: 0.0.40
codegen_flags: <defaults>
</compile_context>

<pallas_src>
import jax
import jax.numpy as jnp
from jax.experimental import pallas as pl
from jax.experimental.pallas import tpu as pltpu

LEAK = 0.2
BN_EPS = 1e-5
_VMEM_LIMIT = 64 * 1024 * 1024


def _leaky(x):
    return jnp.where(x >= 0, x, LEAK * x)


# ----------------------------------------------------------------------------
# Small-input path: single pass, h2 held in VMEM scratch, grid over batch only.
# ----------------------------------------------------------------------------
def _single_pass_call(x, weights, n, c, hw, ndf, ndf2, inv_m):
    w1_t, b1_c, w2_t, gamma_c, beta_c, w3_t = weights

    def kernel(x_ref, w1_ref, b1_ref, w2_ref, g_ref, bt_ref, w3_ref,
               o_ref, sum_ref, sq_ref, h2_scr):
        b = pl.program_id(0)

        @pl.when(b == 0)
        def _():
            sum_ref[...] = jnp.zeros_like(sum_ref)
            sq_ref[...] = jnp.zeros_like(sq_ref)

        # conv1(+bias) -> leaky -> conv2, channels-first: pixels on lane axis.
        h1 = jnp.dot(w1_ref[...], x_ref[...], preferred_element_type=jnp.float32)
        h1 = _leaky(h1 + b1_ref[...])
        h2 = jnp.dot(w2_ref[...], h1, preferred_element_type=jnp.float32)   # (ndf2, hw)

        h2_scr[b] = h2                                   # keep for the finalize pass
        sum_ref[...] += jnp.sum(h2, axis=1, keepdims=True)
        sq_ref[...] += jnp.sum(h2 * h2, axis=1, keepdims=True)

        @pl.when(b == n - 1)
        def _():
            # Fold BatchNorm (training-mode batch stats) into scale/shift.
            mean = sum_ref[...] * inv_m
            var = sq_ref[...] * inv_m - mean * mean
            inv = jax.lax.rsqrt(var + BN_EPS)
            scale = g_ref[...] * inv
            shift = bt_ref[...] - mean * scale
            for b2 in range(n):        # n is a small Python int (gated in wrapper)
                hb = _leaky(h2_scr[b2] * scale + shift)
                o_ref[b2] = jnp.dot(w3_ref[...], hb,
                                    preferred_element_type=jnp.float32)   # (1, hw)

    out = pl.pallas_call(
        kernel,
        out_shape=jax.ShapeDtypeStruct((n, 1, hw), jnp.float32),
        grid_spec=pltpu.PrefetchScalarGridSpec(
            num_scalar_prefetch=0,
            grid=(n,),
            in_specs=[
                pl.BlockSpec((pl.Squeezed(), c, hw), lambda b: (b, 0, 0)),
                pl.BlockSpec((ndf, c), lambda b: (0, 0)),
                pl.BlockSpec((ndf, 1), lambda b: (0, 0)),
                pl.BlockSpec((ndf2, ndf), lambda b: (0, 0)),
                pl.BlockSpec((ndf2, 1), lambda b: (0, 0)),
                pl.BlockSpec((ndf2, 1), lambda b: (0, 0)),
                pl.BlockSpec((1, ndf2), lambda b: (0, 0)),
            ],
            # Whole output lives as a single resident VMEM block, written once
            # at the final grid step, lane-dense along the pixel axis.
            out_specs=pl.BlockSpec((n, 1, hw), lambda b: (0, 0, 0)),
            scratch_shapes=[
                pltpu.VMEM((ndf2, 1), jnp.float32),      # running sum
                pltpu.VMEM((ndf2, 1), jnp.float32),      # running sum of squares
                pltpu.VMEM((n, ndf2, hw), jnp.float32),  # h2 slab (never hits HBM)
            ],
        ),
        compiler_params=pltpu.CompilerParams(
            dimension_semantics=("arbitrary",),
            vmem_limit_bytes=_VMEM_LIMIT),
    )(x, w1_t, b1_c, w2_t, gamma_c, beta_c, w3_t)
    return out


# ----------------------------------------------------------------------------
# Large-input path: two-phase recompute, grid = (phase, batch, pixel-tile).
# ----------------------------------------------------------------------------
def _two_phase_call(x, weights, n, c, hw, ndf, ndf2, inv_m, tm):
    w1_t, b1_c, w2_t, gamma_c, beta_c, w3_t = weights

    # Tile the per-image pixel axis; clamp so tiny images are not over-padded.
    tm = max(128, min(tm, -(-hw // 128) * 128))
    num_tiles = -(-hw // tm)
    hw_pad = num_tiles * tm
    needs_mask = hw_pad != hw
    if needs_mask:
        x = jnp.pad(x, ((0, 0), (0, 0), (0, hw_pad - hw)))

    def kernel(x_ref, w1_ref, b1_ref, w2_ref, g_ref, bt_ref, w3_ref,
               o_ref, sum_ref, sq_ref, sc_ref, sh_ref):
        phase = pl.program_id(0)
        b = pl.program_id(1)
        i = pl.program_id(2)

        # Recompute conv1(+bias) -> leaky -> conv2 for this pixel tile entirely
        # in VMEM.  h2 never touches HBM (recompute is ~free: K=c / K=ndf).
        h1 = jnp.dot(w1_ref[...], x_ref[...], preferred_element_type=jnp.float32)
        h1 = _leaky(h1 + b1_ref[...])
        h2 = jnp.dot(w2_ref[...], h1, preferred_element_type=jnp.float32)   # (ndf2, tm)

        @pl.when(phase == 0)
        def _():
            @pl.when((b == 0) & (i == 0))
            def _():
                sum_ref[...] = jnp.zeros_like(sum_ref)
                sq_ref[...] = jnp.zeros_like(sq_ref)

            def accum(h2v):
                # NOTE: E[x^2]-E[x]^2 in f32 running sums; fine at these sizes.
                # For multi-megapixel batches switch to centered partial sums.
                sum_ref[...] += jnp.sum(h2v, axis=1, keepdims=True)
                sq_ref[...] += jnp.sum(h2v * h2, axis=1, keepdims=True)

            if needs_mask:
                # Only the final (padded) tile pays for the mask; all other
                # tiles take the unmasked VPU-cheap path.
                @pl.when(i == num_tiles - 1)
                def _():
                    col = i * tm + jax.lax.broadcasted_iota(jnp.int32, (1, tm), 1)
                    accum(h2 * (col < hw).astype(jnp.float32))

                @pl.when(i != num_tiles - 1)
                def _():
                    accum(h2)
            else:
                accum(h2)

        @pl.when(phase == 1)
        def _():
            @pl.when((b == 0) & (i == 0))
            def _():
                mean = sum_ref[...] * inv_m
                var = sq_ref[...] * inv_m - mean * mean
                inv = jax.lax.rsqrt(var + BN_EPS)
                scale = g_ref[...] * inv
                sc_ref[...] = scale
                sh_ref[...] = bt_ref[...] - mean * scale
            hb = _leaky(h2 * sc_ref[...] + sh_ref[...])
            # Final 1x1 conv to 1 channel: lane-dense (1, tm) row, unmasked store.
            o_ref[...] = jnp.dot(w3_ref[...], hb, preferred_element_type=jnp.float32)

    out = pl.pallas_call(
        kernel,
        out_shape=jax.ShapeDtypeStruct((n, 1, hw_pad), jnp.float32),
        grid_spec=pltpu.PrefetchScalarGridSpec(
            num_scalar_prefetch=0,
            grid=(2, n, num_tiles),
            in_specs=[
                # x stays NCHW-derived (N, C, HW): no wrapper-side transpose.
                pl.BlockSpec((pl.Squeezed(), c, tm), lambda p, b, i: (b, 0, i)),
                pl.BlockSpec((ndf, c), lambda p, b, i: (0, 0)),
                pl.BlockSpec((ndf, 1), lambda p, b, i: (0, 0)),
                pl.BlockSpec((ndf2, ndf), lambda p, b, i: (0, 0)),
                pl.BlockSpec((ndf2, 1), lambda p, b, i: (0, 0)),
                pl.BlockSpec((ndf2, 1), lambda p, b, i: (0, 0)),
                pl.BlockSpec((1, ndf2), lambda p, b, i: (0, 0)),
            ],
            # Phase 0 pins the output block index to 0 (never written -> no
            # garbage writeback under current revisit semantics); phase 1
            # writes each (b, i) tile exactly once with final data.
            out_specs=pl.BlockSpec((pl.Squeezed(), 1, tm),
                                   lambda p, b, i: (b * p, 0, i * p)),
            scratch_shapes=[
                pltpu.VMEM((ndf2, 1), jnp.float32),   # running sum
                pltpu.VMEM((ndf2, 1), jnp.float32),   # running sum of squares
                pltpu.VMEM((ndf2, 1), jnp.float32),   # folded BN scale
                pltpu.VMEM((ndf2, 1), jnp.float32),   # folded BN shift
            ],
        ),
        compiler_params=pltpu.CompilerParams(
            dimension_semantics=("arbitrary", "arbitrary", "arbitrary"),
            vmem_limit_bytes=_VMEM_LIMIT),
    )(x, w1_t, b1_c, w2_t, gamma_c, beta_c, w3_t)

    return out[:, :, :hw]


# ----------------------------------------------------------------------------
# Wrapper: prepares channels-first weights, dispatches small vs. large path.
# ----------------------------------------------------------------------------
def pixel_discriminator_forward(x_nchw, params, *, tm=8192, force_two_phase=False):
    w1, b1, w2, gamma, beta, w3 = params
    n, c, hgt, wid = x_nchw.shape
    ndf = w1.shape[1]
    ndf2 = w2.shape[1]
    hw = hgt * wid
    inv_m = 1.0 / float(n * hw)

    # Contiguous reshape only -- no NCHW transpose / extra HBM pass.
    x = x_nchw.reshape(n, c, hw).astype(jnp.float32)

    # 1x1 conv weights as (Cout, Cin) so every conv is a plain left-matmul.
    weights = (
        jnp.transpose(w1).astype(jnp.float32),            # (ndf, c)
        b1.reshape(ndf, 1).astype(jnp.float32),
        jnp.transpose(w2).astype(jnp.float32),             # (ndf2, ndf)
        gamma.reshape(ndf2, 1).astype(jnp.float32),
        beta.reshape(ndf2, 1).astype(jnp.float32),
        jnp.transpose(w3).astype(jnp.float32),             # (1, ndf2)
    )

    use_single_pass = (
        (not force_two_phase)
        and n <= 16
        and n * hw * ndf2 * 4 <= 8 * 1024 * 1024          # h2 slab fits in VMEM
        and hw * (c + ndf + 2 * ndf2) * 4 <= 16 * 1024 * 1024
    )

    if use_single_pass:
        out = _single_pass_call(x, weights, n, c, hw, ndf, ndf2, inv_m)
    else:
        out = _two_phase_call(x, weights, n, c, hw, ndf, ndf2, inv_m, tm)

    return out.reshape(n, 1, hgt, wid)


def reference_forward(x_nchw, params):
    """Pure-JAX reference mirroring the PyTorch semantics (for correctness check)."""
    w1, b1, w2, gamma, beta, w3 = params
    n, c, hgt, wid = x_nchw.shape
    x = jnp.transpose(x_nchw, (0, 2, 3, 1)).reshape(-1, c).astype(jnp.float32)
    h1 = _leaky(x @ w1 + b1[None, :])
    h2 = h1 @ w2
    mean = jnp.mean(h2, axis=0, keepdims=True)
    var = jnp.mean((h2 - mean) ** 2, axis=0, keepdims=True)   # biased, training-mode BN
    h2n = (h2 - mean) * jax.lax.rsqrt(var + BN_EPS) * gamma[None, :] + beta[None, :]
    o = _leaky(h2n) @ w3
    return jnp.transpose(o.reshape(n, hgt, wid, 1), (0, 3, 1, 2))


def init_params(key, input_nc, ndf):
    """Deterministic synthetic parameters (conv kernels stored as (Cin, Cout) since k=1)."""
    k1, k2, k3, k4, k5, k6 = jax.random.split(key, 6)
    w1 = 0.2 * jax.random.normal(k1, (input_nc, ndf), jnp.float32)
    b1 = 0.1 * jax.random.normal(k2, (ndf,), jnp.float32)
    w2 = 0.2 * jax.random.normal(k3, (ndf, 2 * ndf), jnp.float32)
    # Non-trivial BN affine so the in-kernel scale/shift fold is actually tested.
    gamma = 1.0 + 0.1 * jax.random.normal(k5, (2 * ndf,), jnp.float32)
    beta = 0.05 * jax.random.normal(k6, (2 * ndf,), jnp.float32)
    w3 = 0.2 * jax.random.normal(k4, (2 * ndf, 1), jnp.float32)
    return (w1, b1, w2, gamma, beta, w3)


if __name__ == "__main__":
    input_nc, ndf = 4, 64
    n, hgt, wid = 2, 16, 16

    key = jax.random.PRNGKey(0)
    kx, kp, kx2 = jax.random.split(key, 3)
    x = jax.random.normal(kx, (n, input_nc, hgt, wid), jnp.float32)
    params = init_params(kp, input_nc, ndf)
    ref = reference_forward(x, params)

    # 1) Default dispatch: single-pass fused kernel (h2 slab resident in VMEM).
    out = jax.block_until_ready(pixel_discriminator_forward(x, params))
    assert out.shape == (n, 1, hgt, wid), out.shape
    assert jnp.allclose(out, ref, atol=1e-3, rtol=1e-3), "single-pass mismatch"

    # 2) Two-phase streaming path (used for large images) forced on the same
    #    data with a small tile to exercise multi-tile / multi-batch stats.
    out2 = jax.block_until_ready(
        pixel_discriminator_forward(x, params, tm=128, force_two_phase=True))
    assert jnp.allclose(out2, ref, atol=1e-3, rtol=1e-3), "two-phase mismatch"

    # 3) Non-128-aligned spatial size: exercises the padded/masked last tile of
    #    the two-phase path and the unaligned full-block small path.
    x_odd = jax.random.normal(kx2, (n, input_nc, 15, 15), jnp.float32)
    ref_odd = reference_forward(x_odd, params)
    out3 = jax.block_until_ready(pixel_discriminator_forward(x_odd, params))
    assert jnp.allclose(out3, ref_odd, atol=1e-3, rtol=1e-3), "odd single-pass mismatch"
    out4 = jax.block_until_ready(
        pixel_discriminator_forward(x_odd, params, tm=128, force_two_phase=True))
    assert jnp.allclose(out4, ref_odd, atol=1e-3, rtol=1e-3), "odd two-phase mismatch"

    print("KERNEL_OK")
</pallas_src>

<mosaic_0001>
module attributes {stable_mosaic.version = 11 : i64} {
  func.func @kernel(%arg0: i32, %arg1: memref<1x4x256xf32, #tpu.memory_space<vmem>>, %arg2: memref<64x4xf32, #tpu.memory_space<vmem>>, %arg3: memref<64x1xf32, #tpu.memory_space<vmem>>, %arg4: memref<128x64xf32, #tpu.memory_space<vmem>>, %arg5: memref<128x1xf32, #tpu.memory_space<vmem>>, %arg6: memref<128x1xf32, #tpu.memory_space<vmem>>, %arg7: memref<1x128xf32, #tpu.memory_space<vmem>>, %arg8: memref<2x1x256xf32, #tpu.memory_space<vmem>>, %arg9: memref<128x1xf32, #tpu.memory_space<vmem>>, %arg10: memref<128x1xf32, #tpu.memory_space<vmem>>, %arg11: memref<2x128x256xf32, #tpu.memory_space<vmem>>) attributes {dimension_semantics = [#tpu.dimension_semantics<arbitrary>], iteration_bounds = array<i64: 2>, scalar_prefetch = 0 : i64, scratch_operands = 3 : i64, tpu.core_type = #tpu.core_type<tc>, window_params = [{transform_indices = @transform_0, window_bounds = array<i64: 1, 4, 256>}, {pipeline_mode = #tpu.pipeline_mode<synchronous>, transform_indices = @transform_1, window_bounds = array<i64: 64, 4>}, {pipeline_mode = #tpu.pipeline_mode<synchronous>, transform_indices = @transform_2, window_bounds = array<i64: 64, 1>}, {pipeline_mode = #tpu.pipeline_mode<synchronous>, transform_indices = @transform_3, window_bounds = array<i64: 128, 64>}, {pipeline_mode = #tpu.pipeline_mode<synchronous>, transform_indices = @transform_4, window_bounds = array<i64: 128, 1>}, {pipeline_mode = #tpu.pipeline_mode<synchronous>, transform_indices = @transform_5, window_bounds = array<i64: 128, 1>}, {pipeline_mode = #tpu.pipeline_mode<synchronous>, transform_indices = @transform_6, window_bounds = array<i64: 1, 128>}, {pipeline_mode = #tpu.pipeline_mode<synchronous>, transform_indices = @transform_7, window_bounds = array<i64: 2, 1, 256>}]} {
    %c0_i32 = arith.constant 0 : i32
    %0 = arith.cmpi eq, %arg0, %c0_i32 : i32
    %1 = arith.extui %0 : i1 to i32
    %c0_i32_0 = arith.constant 0 : i32
    %2 = arith.cmpi ne, %1, %c0_i32_0 : i32
    scf.if %2 {
      %cst_25 = arith.constant 0.000000e+00 : f32
      %35 = vector.broadcast %cst_25 : f32 to vector<128x1xf32>
      %c0_26 = arith.constant 0 : index
      %c0_27 = arith.constant 0 : index
      %36 = vector.load %arg9[%c0_26, %c0_27] : memref<128x1xf32, #tpu.memory_space<vmem>>, vector<128x1xf32>
      tpu.vector_store %arg9[%c0_26, %c0_27], %35 {strides = array<i32>} : memref<128x1xf32, #tpu.memory_space<vmem>>, vector<128x1xf32>,
      %cst_28 = arith.constant 0.000000e+00 : f32
      %37 = vector.broadcast %cst_28 : f32 to vector<128x1xf32>
      %c0_29 = arith.constant 0 : index
      %c0_30 = arith.constant 0 : index
      %38 = vector.load %arg10[%c0_29, %c0_30] : memref<128x1xf32, #tpu.memory_space<vmem>>, vector<128x1xf32>
      tpu.vector_store %arg10[%c0_29, %c0_30], %37 {strides = array<i32>} : memref<128x1xf32, #tpu.memory_space<vmem>>, vector<128x1xf32>,
    } else {
    }
    %c0 = arith.constant 0 : index
    %c0_1 = arith.constant 0 : index
    %3 = vector.load %arg2[%c0, %c0_1] : memref<64x4xf32, #tpu.memory_space<vmem>>, vector<64x4xf32>
    %c0_2 = arith.constant 0 : index
    %c0_3 = arith.constant 0 : index
    %c0_4 = arith.constant 0 : index
    %4 = vector.load %arg1[%c0_2, %c0_3, %c0_4] : memref<1x4x256xf32, #tpu.memory_space<vmem>>, vector<1x4x256xf32>
    %5 = vector.shape_cast %4 : vector<1x4x256xf32> to vector<4x256xf32>
    %cst = arith.constant dense<0.000000e+00> : vector<64x256xf32>
    %6 = tpu.matmul %3, %5, %cst {dimension_numbers = #tpu.dot_dimension_numbers<[1], [0], [0], [1], [0, 0, 1, 1], [], []>} : vector<64x4xf32>, vector<4x256xf32>, vector<64x256xf32> -> vector<64x256xf32>
    %c0_5 = arith.constant 0 : index
    %c0_6 = arith.constant 0 : index
    %7 = vector.load %arg3[%c0_5, %c0_6] : memref<64x1xf32, #tpu.memory_space<vmem>>, vector<64x1xf32>
    %8 = vector.broadcast %7 : vector<64x1xf32> to vector<64x256xf32>
    %9 = arith.addf %6, %8 : vector<64x256xf32>
    %cst_7 = arith.constant 0.000000e+00 : f32
    %10 = vector.broadcast %cst_7 : f32 to vector<64x256xf32>
    %11 = arith.cmpf oge, %9, %10 : vector<64x256xf32>
    %cst_8 = arith.constant 2.000000e-01 : f32
    %12 = vector.broadcast %cst_8 : f32 to vector<64x256xf32>
    %13 = arith.mulf %12, %9 : vector<64x256xf32>
    %14 = arith.select %11, %9, %13 : vector<64x256xi1>, vector<64x256xf32>
    %c0_9 = arith.constant 0 : index
    %c0_10 = arith.constant 0 : index
    %15 = vector.load %arg4[%c0_9, %c0_10] : memref<128x64xf32, #tpu.memory_space<vmem>>, vector<128x64xf32>
    %cst_11 = arith.constant dense<0.000000e+00> : vector<128x256xf32>
    %16 = tpu.matmul %15, %14, %cst_11 {dimension_numbers = #tpu.dot_dimension_numbers<[1], [0], [0], [1], [0, 0, 1, 1], [], []>} : vector<128x64xf32>, vector<64x256xf32>, vector<128x256xf32> -> vector<128x256xf32>
    %17 = arith.index_cast %arg0 : i32 to index
    %c0_12 = arith.constant 0 : index
    %c0_13 = arith.constant 0 : index
    %18 = vector.load %arg11[%17, %c0_12, %c0_13] : memref<2x128x256xf32, #tpu.memory_space<vmem>>, vector<1x128x256xf32>
    %19 = vector.shape_cast %18 : vector<1x128x256xf32> to vector<128x256xf32>
    %20 = vector.shape_cast %16 : vector<128x256xf32> to vector<1x128x256xf32>
    tpu.vector_store %arg11[%17, %c0_12, %c0_13], %20 {strides = array<i32>} : memref<2x128x256xf32, #tpu.memory_space<vmem>>, vector<1x128x256xf32>,
    %c0_14 = arith.constant 0 : index
    %c0_15 = arith.constant 0 : index
    %21 = vector.load %arg9[%c0_14, %c0_15] : memref<128x1xf32, #tpu.memory_space<vmem>>, vector<128x1xf32>
    %cst_16 = arith.constant dense<0.000000e+00> : vector<128xf32>
    %22 = vector.multi_reduction <add>, %16, %cst_16 [1] : vector<128x256xf32> to vector<128xf32>
    %23 = vector.shape_cast %22 : vector<128xf32> to vector<128x1xf32>
    %24 = arith.addf %21, %23 : vector<128x1xf32>
    %c0_17 = arith.constant 0 : index
    %c0_18 = arith.constant 0 : index
    %25 = vector.load %arg9[%c0_17, %c0_18] : memref<128x1xf32, #tpu.memory_space<vmem>>, vector<128x1xf32>
    tpu.vector_store %arg9[%c0_17, %c0_18], %24 {strides = array<i32>} : memref<128x1xf32, #tpu.memory_space<vmem>>, vector<128x1xf32>,
    %c0_19 = arith.constant 0 : index
    %c0_20 = arith.constant 0 : index
    %26 = vector.load %arg10[%c0_19, %c0_20] : memref<128x1xf32, #tpu.memory_space<vmem>>, vector<128x1xf32>
    %27 = arith.mulf %16, %16 : vector<128x256xf32>
    %cst_21 = arith.constant dense<0.000000e+00> : vector<128xf32>
    %28 = vector.multi_reduction <add>, %27, %cst_21 [1] : vector<128x256xf32> to vector<128xf32>
    %29 = vector.shape_cast %28 : vector<128xf32> to vector<128x1xf32>
    %30 = arith.addf %26, %29 : vector<128x1xf32>
    %c0_22 = arith.constant 0 : index
    %c0_23 = arith.constant 0 : index
    %31 = vector.load %arg10[%c0_22, %c0_23] : memref<128x1xf32, #tpu.memory_space<vmem>>, vector<128x1xf32>
    tpu.vector_store %arg10[%c0_22, %c0_23], %30 {strides = array<i32>} : memref<128x1xf32, #tpu.memory_space<vmem>>, vector<128x1xf32>,
    %c1_i32 = arith.constant 1 : i32
    %32 = arith.cmpi eq, %arg0, %c1_i32 : i32
    %33 = arith.extui %32 : i1 to i32
    %c0_i32_24 = arith.constant 0 : i32
    %34 = arith.cmpi ne, %33, %c0_i32_24 : i32
    scf.if %34 {
      %c0_25 = arith.constant 0 : index
      %c0_26 = arith.constant 0 : index
      %35 = vector.load %arg9[%c0_25, %c0_26] : memref<128x1xf32, #tpu.memory_space<vmem>>, vector<128x1xf32>
      %cst_27 = arith.constant 0.001953125 : f32
      %36 = vector.broadcast %cst_27 : f32 to vector<128x1xf32>
      %37 = arith.mulf %35, %36 : vector<128x1xf32>
      %c0_28 = arith.constant 0 : index
      %c0_29 = arith.constant 0 : index
      %38 = vector.load %arg10[%c0_28, %c0_29] : memref<128x1xf32, #tpu.memory_space<vmem>>, vector<128x1xf32>
      %cst_30 = arith.constant 0.001953125 : f32
      %39 = vector.broadcast %cst_30 : f32 to vector<128x1xf32>
      %40 = arith.mulf %38, %39 : vector<128x1xf32>
      %41 = arith.mulf %37, %37 : vector<128x1xf32>
      %42 = arith.subf %40, %41 : vector<128x1xf32>
      %cst_31 = arith.constant 9.99999974E-6 : f32
      %43 = vector.broadcast %cst_31 : f32 to vector<128x1xf32>
      %44 = arith.addf %42, %43 : vector<128x1xf32>
      %45 = math.rsqrt %44 : vector<128x1xf32>
      %c0_32 = arith.constant 0 : index
      %c0_33 = arith.constant 0 : index
      %46 = vector.load %arg5[%c0_32, %c0_33] : memref<128x1xf32, #tpu.memory_space<vmem>>, vector<128x1xf32>
      %47 = arith.mulf %46, %45 : vector<128x1xf32>
      %c0_34 = arith.constant 0 : index
      %c0_35 = arith.constant 0 : index
      %48 = vector.load %arg6[%c0_34, %c0_35] : memref<128x1xf32, #tpu.memory_space<vmem>>, vector<128x1xf32>
      %49 = arith.mulf %37, %47 : vector<128x1xf32>
      %50 = arith.subf %48, %49 : vector<128x1xf32>
      %c0_36 = arith.constant 0 : index
      %c0_37 = arith.constant 0 : index
      %c0_38 = arith.constant 0 : index
      %51 = vector.load %arg11[%c0_36, %c0_37, %c0_38] : memref<2x128x256xf32, #tpu.memory_space<vmem>>, vector<1x128x256xf32>
      %52 = vector.shape_cast %51 : vector<1x128x256xf32> to vector<128x256xf32>
      %53 = vector.broadcast %47 : vector<128x1xf32> to vector<128x256xf32>
      %54 = arith.mulf %52, %53 : vector<128x256xf32>
      %55 = vector.broadcast %50 : vector<128x1xf32> to vector<128x256xf32>
      %56 = arith.addf %54, %55 : vector<128x256xf32>
      %cst_39 = arith.constant 0.000000e+00 : f32
      %57 = vector.broadcast %cst_39 : f32 to vector<128x256xf32>
      %58 = arith.cmpf oge, %56, %57 : vector<128x256xf32>
      %cst_40 = arith.constant 2.000000e-01 : f32
      %59 = vector.broadcast %cst_40 : f32 to vector<128x256xf32>
      %60 = arith.mulf %59, %56 : vector<128x256xf32>
      %61 = arith.select %58, %56, %60 : vector<128x256xi1>, vector<128x256xf32>
      %c0_41 = arith.constant 0 : index
      %c0_42 = arith.constant 0 : index
      %62 = vector.load %arg7[%c0_41, %c0_42] : memref<1x128xf32, #tpu.memory_space<vmem>>, vector<1x128xf32>
      %cst_43 = arith.constant dense<0.000000e+00> : vector<1x256xf32>
      %63 = tpu.matmul %62, %61, %cst_43 {dimension_numbers = #tpu.dot_dimension_numbers<[1], [0], [0], [1], [0, 0, 1, 1], [], []>} : vector<1x128xf32>, vector<128x256xf32>, vector<1x256xf32> -> vector<1x256xf32>
      %c0_44 = arith.constant 0 : index
      %c0_45 = arith.constant 0 : index
      %c0_46 = arith.constant 0 : index
      %64 = vector.load %arg8[%c0_44, %c0_45, %c0_46] : memref<2x1x256xf32, #tpu.memory_space<vmem>>, vector<1x1x256xf32>
      %65 = vector.shape_cast %64 : vector<1x1x256xf32> to vector<1x256xf32>
      %66 = vector.shape_cast %63 : vector<1x256xf32> to vector<1x1x256xf32>
      tpu.vector_store %arg8[%c0_44, %c0_45, %c0_46], %66 {strides = array<i32>} : memref<2x1x256xf32, #tpu.memory_space<vmem>>, vector<1x1x256xf32>,
      %c1 = arith.constant 1 : index
      %c0_47 = arith.constant 0 : index
      %c0_48 = arith.constant 0 : index
      %67 = vector.load %arg11[%c1, %c0_47, %c0_48] : memref<2x128x256xf32, #tpu.memory_space<vmem>>, vector<1x128x256xf32>
      %68 = vector.shape_cast %67 : vector<1x128x256xf32> to vector<128x256xf32>
      %69 = vector.broadcast %47 : vector<128x1xf32> to vector<128x256xf32>
      %70 = arith.mulf %68, %69 : vector<128x256xf32>
      %71 = vector.broadcast %50 : vector<128x1xf32> to vector<128x256xf32>
      %72 = arith.addf %70, %71 : vector<128x256xf32>
      %cst_49 = arith.constant 0.000000e+00 : f32
      %73 = vector.broadcast %cst_49 : f32 to vector<128x256xf32>
      %74 = arith.cmpf oge, %72, %73 : vector<128x256xf32>
      %cst_50 = arith.constant 2.000000e-01 : f32
      %75 = vector.broadcast %cst_50 : f32 to vector<128x256xf32>
      %76 = arith.mulf %75, %72 : vector<128x256xf32>
      %77 = arith.select %74, %72, %76 : vector<128x256xi1>, vector<128x256xf32>
      %c0_51 = arith.constant 0 : index
      %c0_52 = arith.constant 0 : index
      %78 = vector.load %arg7[%c0_51, %c0_52] : memref<1x128xf32, #tpu.memory_space<vmem>>, vector<1x128xf32>
      %cst_53 = arith.constant dense<0.000000e+00> : vector<1x256xf32>
      %79 = tpu.matmul %78, %77, %cst_53 {dimension_numbers = #tpu.dot_dimension_numbers<[1], [0], [0], [1], [0, 0, 1, 1], [], []>} : vector<1x128xf32>, vector<128x256xf32>, vector<1x256xf32> -> vector<1x256xf32>
      %c1_54 = arith.constant 1 : index
      %c0_55 = arith.constant 0 : index
      %c0_56 = arith.constant 0 : index
      %80 = vector.load %arg8[%c1_54, %c0_55, %c0_56] : memref<2x1x256xf32, #tpu.memory_space<vmem>>, vector<1x1x256xf32>
      %81 = vector.shape_cast %80 : vector<1x1x256xf32> to vector<1x256xf32>
      %82 = vector.shape_cast %79 : vector<1x256xf32> to vector<1x1x256xf32>
      tpu.vector_store %arg8[%c1_54, %c0_55, %c0_56], %82 {strides = array<i32>} : memref<2x1x256xf32, #tpu.memory_space<vmem>>, vector<1x1x256xf32>,
    } else {
    }
    return
  }
  func.func @transform_0(%arg0: i32) -> (i32, i32, i32) {
    %c0_i32 = arith.constant 0 : i32
    %c0_i32_0 = arith.constant 0 : i32
    %c0_i32_1 = arith.constant 0 : i32
    return %arg0, %c0_i32, %c0_i32_0 : i32, i32, i32
  }
  func.func @transform_1(%arg0: i32) -> (i32, i32) {
    %c0_i32 = arith.constant 0 : i32
    %c0_i32_0 = arith.constant 0 : i32
    %c0_i32_1 = arith.constant 0 : i32
    return %c0_i32, %c0_i32_0 : i32, i32
  }
  func.func @transform_2(%arg0: i32) -> (i32, i32) {
    %c0_i32 = arith.constant 0 : i32
    %c0_i32_0 = arith.constant 0 : i32
    %c0_i32_1 = arith.constant 0 : i32
    return %c0_i32, %c0_i32_0 : i32, i32
  }
  func.func @transform_3(%arg0: i32) -> (i32, i32) {
    %c0_i32 = arith.constant 0 : i32
    %c0_i32_0 = arith.constant 0 : i32
    %c0_i32_1 = arith.constant 0 : i32
    return %c0_i32, %c0_i32_0 : i32, i32
  }
  func.func @transform_4(%arg0: i32) -> (i32, i32) {
    %c0_i32 = arith.constant 0 : i32
    %c0_i32_0 = arith.constant 0 : i32
    %c0_i32_1 = arith.constant 0 : i32
    return %c0_i32, %c0_i32_0 : i32, i32
  }
  func.func @transform_5(%arg0: i32) -> (i32, i32) {
    %c0_i32 = arith.constant 0 : i32
    %c0_i32_0 = arith.constant 0 : i32
    %c0_i32_1 = arith.constant 0 : i32
    return %c0_i32, %c0_i32_0 : i32, i32
  }
  func.func @transform_6(%arg0: i32) -> (i32, i32) {
    %c0_i32 = arith.constant 0 : i32
    %c0_i32_0 = arith.constant 0 : i32
    %c0_i32_1 = arith.constant 0 : i32
    return %c0_i32, %c0_i32_0 : i32, i32
  }
  func.func @transform_7(%arg0: i32) -> (i32, i32, i32) {
    %c0_i32 = arith.constant 0 : i32
    %c0_i32_0 = arith.constant 0 : i32
    %c0_i32_1 = arith.constant 0 : i32
    %c0_i32_2 = arith.constant 0 : i32
    return %c0_i32, %c0_i32_0, %c0_i32_1 : i32, i32, i32
  }
}

</mosaic_0001>

<bundles_post_ra>
// kernel: tpu_custom_call.1
= control target key start
LH: loop header
LB: loop body
LE: loop exit
PB: predicated region body
PF: predicated region fallthrough
CT: control target
= control target key end

     0   :  { %12 = vsyncpa [#allocation6], 0  ;;  %s3648_s0 = inlined_call_operand.hbm [shape: f32[2,4,256], index: 0, kind: input, shape index: {}]   ;;  %s3649_s1 = inlined_call_operand.hbm [shape: f32[64,4], index: 1, kind: input, shape index: {}]   ;;  %s3650_s2 = inlined_call_operand.hbm [shape: f32[64,1], index: 2, kind: input, shape index: {}]   ;;  %s3651_s3 = inlined_call_operand.hbm [shape: f32[128,64], index: 3, kind: input, shape index: {}]   ;;  %s3652_s4 = inlined_call_operand.hbm [shape: f32[128,1], index: 4, kind: input, shape index: {}]   ;;  %s3653_s5 = inlined_call_operand.hbm [shape: f32[128,1], index: 5, kind: input, shape index: {}]   ;;  %s3654_s6 = inlined_call_operand.hbm [shape: f32[1,128], index: 6, kind: input, shape index: {}]   ;;  %s3655_s7 = inlined_call_operand.hbm [shape: f32[2,1,256], index: 7, kind: output, shape index: {}]  }
   0x1   :  { %14 = vsyncpa [#allocation6 + $0x1], 0 }
   0x2   :  { %15 = vsyncpa [#allocation9], 0 }
   0x3   :  { %16 = vsyncpa [#allocation12], 0 }
   0x4   :  { %17 = vsyncpa [#allocation15], 0 }
   0x5   :  { %18 = vsyncpa [#allocation7], 0  ;;  %s2835_s24 = smov 0   ;;  %s2837_s25 = smov 0  }
   0x6   :  { %s2839_s26 = smov 0   ;;  %s2841_s27 = smov 0  }
   0x7 LB: > { %s2777_s28 = smov [#allocation8]   ;;  %s2856_s30 = sadd.s32 4294967295, %s2775_s27   ;;  %s2775_s27 = sphi %s2841_s27, %s3675_s27   ;;  %s2771_s26 = sphi %s2839_s26, %s3674_s26   ;;  %s2767_s25 = sphi %s2837_s25, %s3673_s25   ;;  %s2763_s24 = sphi %s2835_s24, %s3672_s24  }
   0x8   : > { %s214_s29 = sshll.u32 %s2777_s28, 4  ;;  %p2204_p0 = scmp.ge.s32.totalorder %s2775_s27, 1  ;;  %s2862_s29 = int_to_ptr.vmem [resolvable:$true] %s214_s29 }
   0x9   : > { %p3656_p1 = scmp.eq.s32.totalorder %s2856_s30, 0  ;;  %p202_p2 = scmp.lt.s32.totalorder %s2775_s27, 3 }
   0xa   : > { %s2778_s9 = smov [#allocation11]   ;;  %s2779_s12 = smov [#allocation14]  }
   0xb   : > { %p2864_p4 = pnand %p2204_p0, %p202_p2  ;;  %s240_s10 = sshll.u32 %s2778_s9, 4  ;;  %s2876_s10 = int_to_ptr.vmem [resolvable:$true] %s240_s10 }
   0xc   : > { %s266_s13 = sshll.u32 %s2779_s12, 4  ;;  %s2501_s16 = scalar_lea.hbm %s3649_s1, 1024  ;;  %s2878_s13 = int_to_ptr.vmem [resolvable:$true] %s266_s13 }
   0xd   : > { %s3658_s8 = scalar_select %p2864_p4, 1, 0 }
   0xe   : > { %p2377_p5 = pneg %p2864_p4  ;;  %p2502_p7 = scmp.ne.s32.totalorder %s3649_s1, %s2501_s16 }
   0xf   : > { %p2508_p11 = scmp.lt.u32.totalorder %s2501_s16, %s3649_s1 }
  0x10   : > { %p2872_p6 = pnand %p2377_p5, %p3656_p1 }
  0x12   : > { %p2888_p8 = pneg %p2872_p6 }
  0x14   : > { %p2504_p9 = pnand %p2888_p8, %p2502_p7 }
  0x16   : > { %p2505_p10 = pneg %p2504_p9 }
  0x18   : > { %p2510_p12 = pnand %p2508_p11, %p2505_p10 }
  0x1a   : > { %2513 = shalt.err (!%p2510_p12)
}
  0x1b   : > { %s2514_s22 = scalar_lea.vmem %s2862_s29, 1024  ;;  %p2522_p5 = scmp.lt.s32.totalorder %s2862_s29, %s2862_s29 }
  0x1c   : > { %p2515_p13 = scmp.ne.s32.totalorder %s2862_s29, %s2514_s22  ;;  %p2523_p3 = scmp.lt.s32.totalorder %s2514_s22, %s2514_s22 }
  0x1e   : > { %p2517_p0 = pnand %p2515_p13, %p2888_p8  ;;  %p2524_p7 = por %p2523_p3, %p2522_p5 }
  0x20   : > { %p2518_p2 = pneg %p2517_p0 }
  0x22   : > { %p2525_p9 = pnand %p2524_p7, %p2518_p2 }
  0x24   : > { %2528 = shalt.err (!%p2525_p9)
}
  0x25   : > { %s2780_s23 = smov 128   ;;  %s2781_s28 = smov 8  }
  0x26   : > { %2380 = dma.hbm_to_vmem [thread:$0]  (!%p2872_p6), %s3649_s1, 1024, %s2862_s29, [#allocation9], %s2780_s23, %s2780_s23, %s2781_s28  }
  0x27   : > { %s2529_s16 = scalar_lea.hbm %s3651_s3, 2048 }
  0x28   : > { %p2530_p3 = scmp.ne.s32.totalorder %s3651_s3, %s2529_s16  ;;  %p2536_p12 = scmp.lt.u32.totalorder %s2529_s16, %s3651_s3 }
  0x2a   : > { %p2532_p10 = pnand %p2530_p3, %p2888_p8 }
  0x2c   : > { %p2533_p11 = pneg %p2532_p10 }
  0x2e   : > { %p2538_p13 = pnand %p2536_p12, %p2533_p11 }
  0x30   : > { %2541 = shalt.err (!%p2538_p13)
}
  0x31   : > { %s2542_s29 = scalar_lea.vmem %s2876_s10, 2048  ;;  %p2550_p7 = scmp.lt.s32.totalorder %s2876_s10, %s2876_s10 }
  0x32   : > { %p2543_p0 = scmp.ne.s32.totalorder %s2876_s10, %s2542_s29  ;;  %p2551_p9 = scmp.lt.s32.totalorder %s2542_s29, %s2542_s29 }
  0x34   : > { %p2545_p2 = pnand %p2543_p0, %p2888_p8  ;;  %p2552_p3 = por %p2551_p9, %p2550_p7 }
  0x36   : > { %p2546_p5 = pneg %p2545_p2 }
  0x38   : > { %p2553_p10 = pnand %p2552_p3, %p2546_p5 }
  0x3a   : > { %2556 = shalt.err (!%p2553_p10)
}
  0x3b   : > { %2386 = dma.hbm_to_vmem [thread:$0]  (!%p2872_p6), %s3651_s3, 2048, %s2876_s10, [#allocation12], %s2780_s23, %s2780_s23, %s2781_s28  }
  0x3c   : > { %s2557_s15 = scalar_lea.hbm %s3653_s5, 2048 }
  0x3d   : > { %p2558_p11 = scmp.ne.s32.totalorder %s3653_s5, %s2557_s15  ;;  %p2564_p0 = scmp.lt.u32.totalorder %s2557_s15, %s3653_s5 }
  0x3f   : > { %p2560_p12 = pnand %p2558_p11, %p2888_p8 }
  0x41   : > { %p2561_p13 = pneg %p2560_p12 }
  0x43   : > { %p2566_p2 = pnand %p2564_p0, %p2561_p13 }
  0x45   : > { %2569 = shalt.err (!%p2566_p2)
}
  0x46   : > { %s2570_s10 = scalar_lea.vmem %s2878_s13, 2048  ;;  %p2578_p3 = scmp.lt.s32.totalorder %s2878_s13, %s2878_s13 }
  0x47   : > { %p2571_p5 = scmp.ne.s32.totalorder %s2878_s13, %s2570_s10  ;;  %p2579_p10 = scmp.lt.s32.totalorder %s2570_s10, %s2570_s10 }
  0x49   : > { %p2573_p7 = pnand %p2571_p5, %p2888_p8  ;;  %p2580_p11 = por %p2579_p10, %p2578_p3 }
  0x4b   : > { %p2574_p9 = pneg %p2573_p7 }
  0x4d   : > { %p2581_p12 = pnand %p2580_p11, %p2574_p9 }
  0x4f   : > { %2584 = shalt.err (!%p2581_p12)
}
  0x50   : > { %2392 = dma.hbm_to_vmem [thread:$0]  (!%p2872_p6), %s3653_s5, 2048, %s2878_s13, [#allocation15], %s2780_s23, %s2780_s23, %s2781_s28  }
  0x51   : > { %s2782_s22 = smov [#allocation10]   ;;  %s2783_s12 = smov [#allocation13]  }
  0x52   : > { %s227_s9 = sshll.u32 %s2782_s22, 4  ;;  %s253_s14 = sshll.u32 %s2783_s12, 4  ;;  %s228_s9 = int_to_ptr.vmem [resolvable:$true] %s227_s9  ;;  %s254_s14 = int_to_ptr.vmem [resolvable:$true] %s253_s14 }
  0x53   : > { %s2585_s17 = scalar_lea.hbm %s3650_s2, 1024 }
  0x54   : > { %p2586_p13 = scmp.ne.s32.totalorder %s3650_s2, %s2585_s17  ;;  %p2592_p5 = scmp.lt.u32.totalorder %s2585_s17, %s3650_s2 }
  0x56   : > { %p2588_p0 = pnand %p2586_p13, %p2888_p8 }
  0x58   : > { %p2589_p2 = pneg %p2588_p0 }
  0x5a   : > { %p2594_p7 = pnand %p2592_p5, %p2589_p2 }
  0x5c   : > { %2597 = shalt.err (!%p2594_p7)
}
  0x5d   : > { %s2598_s13 = scalar_lea.vmem %s228_s9, 1024  ;;  %p2606_p11 = scmp.lt.s32.totalorder %s228_s9, %s228_s9 }
  0x5e   : > { %p2599_p9 = scmp.ne.s32.totalorder %s228_s9, %s2598_s13  ;;  %p2607_p12 = scmp.lt.s32.totalorder %s2598_s13, %s2598_s13 }
  0x60   : > { %p2601_p3 = pnand %p2599_p9, %p2888_p8  ;;  %p2608_p1 = por %p2607_p12, %p2606_p11 }
  0x62   : > { %p2602_p10 = pneg %p2601_p3 }
  0x64   : > { %p2609_p4 = pnand %p2608_p1, %p2602_p10 }
  0x66   : > { %2612 = shalt.err (!%p2609_p4)
}
  0x67   : > { %2383 = dma.hbm_to_vmem [thread:$0]  (!%p2872_p6), %s3650_s2, 1024, %s228_s9, [#allocation9], %s2780_s23, %s2780_s23, %s2781_s28  }
  0x68   : > { %s2613_s16 = scalar_lea.hbm %s3652_s4, 2048 }
  0x69   : > { %p2614_p1 = scmp.ne.s32.totalorder %s3652_s4, %s2613_s16  ;;  %p2620_p0 = scmp.lt.u32.totalorder %s2613_s16, %s3652_s4 }
  0x6b   : > { %p2616_p4 = pnand %p2614_p1, %p2888_p8 }
  0x6d   : > { %p2617_p13 = pneg %p2616_p4 }
  0x6f   : > { %p2622_p2 = pnand %p2620_p0, %p2617_p13 }
  0x71   : > { %2625 = shalt.err (!%p2622_p2)
}
  0x72   : > { %s2626_s21 = scalar_lea.vmem %s254_s14, 2048  ;;  %p2634_p3 = scmp.lt.s32.totalorder %s254_s14, %s254_s14 }
  0x73   : > { %p2627_p5 = scmp.ne.s32.totalorder %s254_s14, %s2626_s21  ;;  %p2635_p10 = scmp.lt.s32.totalorder %s2626_s21, %s2626_s21 }
  0x75   : > { %p2629_p7 = pnand %p2627_p5, %p2888_p8  ;;  %p2636_p11 = por %p2635_p10, %p2634_p3 }
  0x77   : > { %p2630_p9 = pneg %p2629_p7 }
  0x79   : > { %p2637_p12 = pnand %p2636_p11, %p2630_p9 }
  0x7b   : > { %2640 = shalt.err (!%p2637_p12)
}
  0x7c   : > { %2389 = dma.hbm_to_vmem [thread:$0]  (!%p2872_p6), %s3652_s4, 2048, %s254_s14, [#allocation12], %s2780_s23, %s2780_s23, %s2781_s28  }
  0x7d   : > { %s2784_s29 = smov [#allocation16]   ;;  %s2641_s16 = scalar_lea.hbm %s3654_s6, 16 }
  0x7e   : > { %s280_s22 = sshll.u32 %s2784_s29, 4  ;;  %p2642_p1 = scmp.ne.s32.totalorder %s3654_s6, %s2641_s16  ;;  %s281_s22 = int_to_ptr.vmem [resolvable:$true] %s280_s22 }
  0x7f   : > { %p2648_p0 = scmp.lt.u32.totalorder %s2641_s16, %s3654_s6 }
  0x80   : > { %p2644_p4 = pnand %p2642_p1, %p2888_p8 }
  0x82   : > { %p2645_p13 = pneg %p2644_p4 }
  0x84   : > { %p2650_p2 = pnand %p2648_p0, %p2645_p13 }
  0x86   : > { %2653 = shalt.err (!%p2650_p2)
}
  0x87   : > { %s2654_s23 = scalar_lea.vmem %s281_s22, 16  ;;  %s2661_s28 = scalar_lea.vmem %s281_s22, 32 }
  0x88   : > { %p2655_p5 = scmp.ne.s32.totalorder %s281_s22, %s2654_s23  ;;  %p2662_p3 = scmp.lt.s32.totalorder %s281_s22, %s281_s22 }
  0x89   : > { %p2663_p10 = scmp.lt.s32.totalorder %s2661_s28, %s2654_s23 }
  0x8a   : > { %p2657_p7 = pnand %p2655_p5, %p2888_p8 }
  0x8b   : > { %p2664_p11 = por %p2663_p10, %p2662_p3 }
  0x8c   : > { %p2658_p9 = pneg %p2657_p7 }
  0x8e   : > { %p2665_p12 = pnand %p2664_p11, %p2658_p9 }
  0x90   : > { %2668 = shalt.err (!%p2665_p12)
}
  0x91   : > { %2395 = dma.hbm_to_vmem [thread:$0]  (!%p2872_p6), %s3654_s6, 16, %s281_s22, [#allocation15]  }
  0x92   : > { %s3025_s19 = sadd.s32 1, %s2775_s27   ;;  %s31_s11 = sadd.s32 1, %s2771_s26 }
  0x93   : > { %s28_s9 = ssub.s32 %s2775_s27, %s3025_s19  ;;  %p38_p8 = scmp.ne.s32.totalorder %s2771_s26, %s2767_s25 }
  0x94   : > { %p29_p1 = scmp.eq.s32.totalorder %s28_s9, 0  ;;  %p39_p4 = scmp.eq.s32.totalorder %s2775_s27, 0 }
  0x95   : > { %p44_p13 = scmp.ne.s32.totalorder %s2767_s25, %s2763_s24  ;;  %p2406_p0 = scmp.lt.s32.totalorder %s2775_s27, 2 }
  0x96   : > { %s3037_s13 = scalar_select %p29_p1, %s2771_s26, %s31_s11  }
  0x97   : > { %p40_p2 = por %p39_p4, %p38_p8  ;;  %p3661_p5 = scmp.eq.s32.totalorder %s2856_s30, 0 }
  0x98   : > { %s291_s12 = sand.u32 1, %s2771_s26   ;;  %s2257_s22 = sshll.u32 %s2775_s27, 7 }
  0x99   : > { %p3041_p7 = por %p3661_p5, %p44_p13  ;;  %s2212_s15 = sshll.u32 %s291_s12, 3 }
  0x9a   : > { %s3050_s18 = scalar_lea.hbm %s3648_s0, %s2257_s22  ;;  %s295_s24 = scalar_lea.vmem [#allocation5], %s2212_s15 }
  0x9b   : > { %s303_s20 = sshll.u32 %s295_s24, 4  ;;  %p3052_p6 = pnand %p2406_p0, %p40_p2  ;;  %s3056_s20 = int_to_ptr.vmem [resolvable:$true] %s303_s20 }
  0x9c   : > { %s292_s27 = scalar_lea.sflag [#allocation6], %s291_s12  ;;  %s2669_s23 = scalar_lea.hbm %s3050_s18, 128 }
  0x9d   : > { %p2670_p9 = scmp.ne.s32.totalorder %s3050_s18, %s2669_s23  ;;  %p2671_p3 = pneg %p3052_p6 }
  0x9e   : > { %s2674_s21 = scalar_lea.hbm %s3648_s0, 256  ;;  %p2675_p12 = scmp.lt.u32.totalorder %s3050_s18, %s3648_s0 }
  0x9f   : > { %p2672_p10 = pnand %p2671_p3, %p2670_p9  ;;  %p2676_p8 = scmp.lt.u32.totalorder %s2674_s21, %s2669_s23 }
  0xa0   : > { %p2678_p4 = scmp.lt.u32.totalorder %s2669_s23, %s3050_s18 }
  0xa1   : > { %p2673_p11 = pneg %p2672_p10  ;;  %p2677_p1 = por %p2676_p8, %p2675_p12 }
  0xa3   : > { %p2679_p13 = por %p2678_p4, %p2677_p1 }
  0xa5   : > { %p2680_p0 = pnand %p2679_p13, %p2673_p11 }
  0xa7   : > { %2683 = shalt.err (!%p2680_p0)
}
  0xa8   : > { %s2684_s12 = scalar_lea.vmem %s3056_s20, 128  ;;  %s2785_s22 = smov [#allocation5]  }
  0xa9   : > { %p2685_p2 = scmp.ne.s32.totalorder %s3056_s20, %s2684_s12  ;;  %s2689_s15 = sshll.u32 %s2785_s22, 4  ;;  %s2690_s15 = int_to_ptr.vmem [resolvable:$false] %s2689_s15 }
  0xaa   : > { %s2691_s16 = scalar_lea.vmem %s2690_s15, 256  ;;  %p2692_p10 = scmp.lt.s32.totalorder %s3056_s20, %s2690_s15 }
  0xab   : > { %p2687_p5 = pnand %p2685_p2, %p2671_p3  ;;  %p2693_p12 = scmp.lt.s32.totalorder %s2691_s16, %s2684_s12 }
  0xad   : > { %p2688_p9 = pneg %p2687_p5  ;;  %p2694_p8 = por %p2693_p12, %p2692_p10 }
  0xaf   : > { %p2695_p1 = pnand %p2694_p8, %p2688_p9 }
  0xb1   : > { %2698 = shalt.err (!%p2695_p1)
}
  0xb2   : > { %2399 = dma.hbm_to_vmem [thread:$0]  (!%p3052_p6), %s3050_s18, 128, %s3056_s20, %s292_s27  }
  0xb3   : > { %p3664_p11 = scmp.ne.s32.totalorder %s3658_s8, 0 }
  0xb4   : > { %s314_s17 = sand.u32 (!%p3664_p11), 1, %s2767_s25  }
  0xb5   : > { %312 = sbr.rel (%p3664_p11) target bundleno = 1368 (0x558), region = 48  ;;  %s3086_s24 = sshll.u32 (!%p3664_p11), %s314_s17, 3 }
  0xb6   : > { %s315_s23 = scalar_lea.sflag (!%p3664_p11), [#allocation6], %s314_s17  ;;  %s318_s28 = scalar_lea.vmem (!%p3664_p11), [#allocation5], %s3086_s24 }
  0xbc   : > { %2742 = dma.done.wait (%p3041_p7), %s315_s23, 128  }
  0xbd   : > { %2744 = vsyncadd (%p3041_p7), %s315_s23, 4294967168  ;;  %p3665_p3 = scmp.eq.s32.totalorder %s2856_s30, 0 }
  0xbf   : > { %2746 = dma.done.wait (%p3665_p3), [#allocation9], 2048   ;;  %p3666_p6 = pmov %p3665_p3 }
  0xc0   : > { %p3667_p4 = pmov %p3665_p3 }
  0xc1   : > { %2748 = vsyncadd (%p3666_p6), [#allocation9], 4294965248 }
  0xc2   : > { %2750 = dma.done.wait (%p3667_p4), [#allocation12], 4096   ;;  %p3668_p13 = pmov %p3665_p3 }
  0xc3   : > { %p3669_p0 = pmov %p3665_p3 }
  0xc4   : > { %2752 = vsyncadd (%p3668_p13), [#allocation12], 4294963200 }
  0xc5   : > { %2754 = dma.done.wait (%p3669_p0), [#allocation15], 2064   ;;  %p3670_p2 = pmov %p3669_p0 }
  0xc6   : > { %p3671_p7 = scmp.ne.s32.totalorder %s2856_s30, 0 }
  0xc7   : > { %2756 = vsyncadd (%p3670_p2), [#allocation15], 4294965232  ;;  %vm372_vm0 = vcmask (!%p3671_p7), 7168   ;;  %v2786_v0 = vmov (!%p3671_p7), 0.0  }
  0xc8   : > { %371 = sbr.rel (%p3671_p7) target bundleno = 216 (0xd8), region = 80  ;;  %373 = vst.msk [vmem:[#allocation2] sm:$0xff] (!%p3671_p7), %vm372_vm0, %v2786_v0  ;;  %374 = vst.msk [vmem:[#allocation2 + $0x8] sm:$0xff] (!%p3671_p7), %vm372_vm0, %v2786_v0 }
  0xc9   : > { %375 = vst.msk [vmem:[#allocation2 + $0x10] sm:$0xff] (!%p3671_p7), %vm372_vm0, %v2786_v0  ;;  %376 = vst.msk [vmem:[#allocation2 + $0x18] sm:$0xff] (!%p3671_p7), %vm372_vm0, %v2786_v0 }
  0xca   : > { %377 = vst.msk [vmem:[#allocation2 + $0x20] sm:$0xff] (!%p3671_p7), %vm372_vm0, %v2786_v0  ;;  %378 = vst.msk [vmem:[#allocation2 + $0x28] sm:$0xff] (!%p3671_p7), %vm372_vm0, %v2786_v0 }
  0xcb   : > { %379 = vst.msk [vmem:[#allocation2 + $0x30] sm:$0xff] (!%p3671_p7), %vm372_vm0, %v2786_v0  ;;  %380 = vst.msk [vmem:[#allocation2 + $0x38] sm:$0xff] (!%p3671_p7), %vm372_vm0, %v2786_v0 }
  0xcc   : > { %381 = vst.msk [vmem:[#allocation2 + $0x40] sm:$0xff] (!%p3671_p7), %vm372_vm0, %v2786_v0  ;;  %382 = vst.msk [vmem:[#allocation2 + $0x48] sm:$0xff] (!%p3671_p7), %vm372_vm0, %v2786_v0 }
  0xcd   : > { %383 = vst.msk [vmem:[#allocation2 + $0x50] sm:$0xff] (!%p3671_p7), %vm372_vm0, %v2786_v0  ;;  %384 = vst.msk [vmem:[#allocation2 + $0x58] sm:$0xff] (!%p3671_p7), %vm372_vm0, %v2786_v0 }
  0xce   : > { %385 = vst.msk [vmem:[#allocation2 + $0x60] sm:$0xff] (!%p3671_p7), %vm372_vm0, %v2786_v0  ;;  %386 = vst.msk [vmem:[#allocation2 + $0x68] sm:$0xff] (!%p3671_p7), %vm372_vm0, %v2786_v0 }
  0xcf   : > { %387 = vst.msk [vmem:[#allocation2 + $0x70] sm:$0xff] %vm372_vm0, %v2786_v0  ;;  %388 = vst.msk [vmem:[#allocation2 + $0x78] sm:$0xff] %vm372_vm0, %v2786_v0 }
  0xd0   : > { %389 = vst.msk [vmem:[#allocation3] sm:$0xff] %vm372_vm0, %v2786_v0  ;;  %390 = vst.msk [vmem:[#allocation3 + $0x8] sm:$0xff] %vm372_vm0, %v2786_v0 }
  0xd1   : > { %391 = vst.msk [vmem:[#allocation3 + $0x10] sm:$0xff] %vm372_vm0, %v2786_v0  ;;  %392 = vst.msk [vmem:[#allocation3 + $0x18] sm:$0xff] %vm372_vm0, %v2786_v0 }
  0xd2   : > { %393 = vst.msk [vmem:[#allocation3 + $0x20] sm:$0xff] %vm372_vm0, %v2786_v0  ;;  %394 = vst.msk [vmem:[#allocation3 + $0x28] sm:$0xff] %vm372_vm0, %v2786_v0 }
  0xd3   : > { %395 = vst.msk [vmem:[#allocation3 + $0x30] sm:$0xff] %vm372_vm0, %v2786_v0  ;;  %396 = vst.msk [vmem:[#allocation3 + $0x38] sm:$0xff] %vm372_vm0, %v2786_v0 }
  0xd4   : > { %397 = vst.msk [vmem:[#allocation3 + $0x40] sm:$0xff] %vm372_vm0, %v2786_v0  ;;  %398 = vst.msk [vmem:[#allocation3 + $0x48] sm:$0xff] %vm372_vm0, %v2786_v0 }
  0xd5   : > { %399 = vst.msk [vmem:[#allocation3 + $0x50] sm:$0xff] %vm372_vm0, %v2786_v0  ;;  %400 = vst.msk [vmem:[#allocation3 + $0x58] sm:$0xff] %vm372_vm0, %v2786_v0 }
  0xd6   : > { %401 = vst.msk [vmem:[#allocation3 + $0x60] sm:$0xff] %vm372_vm0, %v2786_v0  ;;  %402 = vst.msk [vmem:[#allocation3 + $0x68] sm:$0xff] %vm372_vm0, %v2786_v0 }
  0xd7   : > { %403 = vst.msk [vmem:[#allocation3 + $0x70] sm:$0xff] %vm372_vm0, %v2786_v0  ;;  %404 = vst.msk [vmem:[#allocation3 + $0x78] sm:$0xff] %vm372_vm0, %v2786_v0 }
  0xd8 PF: > { %v413_v1 = vld [vmem:[%s318_s28] sm:$0xff]  ;;  %vm489_vm1 = vcmask 1043456   ;;  %v2787_v3 = vmov 0.0   ;;  %v405_v4 = vld [vmem:[#allocation8] sm:$0xff]  ;;  %vm464_vm2 = vcmask 31744   ;;  %v2788_v5 = vmov 0  }
  0xd9   : > { %v463_v2 = vcombine.high %v413_v1, %v413_v1  ;;  %558 = vmatprep.mubr.f32.mxu0 %v2787_v3  ;;  %814 = vmatprep.mubr.f32.mxu1 %v2787_v3  ;;  %v414_v6 = vld [vmem:[#allocation10] sm:$0xff]  ;;  %v416_v7 = vld [vmem:[#allocation10 + $0x10] sm:$0xff]  ;;  %v415_v8 = vld [vmem:[#allocation10 + $0x8] sm:$0xff]  ;;  %s2258_s8 = sshll.u32 %s2856_s30, 8  ;;  %p2252_p5 = scmp.ne.s32.totalorder %s2856_s30, 1 }
  0xda   : > { %2464 = vset.pattern.permute.xlu0 %v2788_v5  ;;  %2465 = vset.pattern.permute.xlu1 %v2788_v5  ;;  %v406_v9 = vld [vmem:[#allocation8 + $0x8] sm:$0xff]  ;;  %v417_v10 = vld [vmem:[#allocation10 + $0x18] sm:$0xff]  ;;  %v418_v11 = vld [vmem:[#allocation10 + $0x20] sm:$0xff]  ;;  %s3190_s29 = scalar_lea.vmem [#allocation4], %s2258_s8 }
  0xdb   : > { %2224 = vmatprep.subr.msk.mxu0 %vm489_vm1, %v463_v2  ;;  %424 = vperm.xlu0 %2464, %v414_v6   ;;  %v407_v12 = vld [vmem:[#allocation8 + $0x10] sm:$0xff]  ;;  %v419_v13 = vld [vmem:[#allocation10 + $0x28] sm:$0xff]  ;;  %v408_v15 = vld [vmem:[#allocation8 + $0x18] sm:$0xff] }
  0xdc   : > { %2225 = vmatpush1.msk.msra.mxu0 %vm489_vm1, %v413_v1  ;;  %434 = vperm.xlu1 %2465, %v416_v7   ;;  %v420_v14 = vld [vmem:[#allocation10 + $0x30] sm:$0xff]  ;;  %v421_v16 = vld [vmem:[#allocation10 + $0x38] sm:$0xff]  ;;  %v409_v17 = vld [vmem:[#allocation8 + $0x20] sm:$0xff] }
  0xdd   : > { %2226 = vmatmul.mubr.msk.f32.vlgmr.msra.gmra.mrb[0].mxu0 %vm464_vm2, %v405_v4  ;;  %v410_v18 = vld [vmem:[#allocation8 + $0x28] sm:$0xff]  ;;  %v411_v19 = vld [vmem:[#allocation8 + $0x30] sm:$0xff]  ;;  %v412_v20 = vld [vmem:[#allocation8 + $0x38] sm:$0xff] }
  0xde   : > { %564 = vmatprep.mubr.f32.mxu0 %v2787_v3 }
  0xdf   : > { %429 = vperm.xlu0 %2464, %v415_v8  }
  0xe0   : > { %439 = vperm.xlu1 %2465, %v417_v10  }
  0xe1   : > { %2227 = vmatmul.mubr.msk.f32.gmra.mrb[2].mxu0 %vm464_vm2, %v406_v9 }
  0xe2   : > { %570 = vmatprep.mubr.f32.mxu0 %v2787_v3 }
  0xe3   : > { %444 = vperm.xlu0 %2464, %v418_v11  }
  0xe4   : > { %449 = vperm.xlu1 %2465, %v419_v13  }
  0xe5   : > { %2228 = vmatmul.mubr.msk.f32.gmra.mrb[4].mxu0 %vm464_vm2, %v407_v12 }
  0xe6   : > { %576 = vmatprep.mubr.f32.mxu0 %v2787_v3 }
  0xe7   : > { %454 = vperm.xlu0 %2464, %v420_v14  }
  0xe8   : > { %459 = vperm.xlu1 %2465, %v421_v16  }
  0xe9   : > { %2229 = vmatmul.mubr.msk.f32.gmra.mrb[6].mxu0 %vm464_vm2, %v408_v15 }
  0xea   : > { %582 = vmatprep.mubr.f32.mxu0 %v2787_v3 }
  0xed   : > { %2230 = vmatmul.mubr.msk.f32.gmra.mrb[8].mxu0 %vm464_vm2, %v409_v17 }
  0xee   : > { %588 = vmatprep.mubr.f32.mxu0 %v2787_v3 }
  0xf1   : > { %2231 = vmatmul.mubr.msk.f32.gmra.mrb[10].mxu0 %vm464_vm2, %v410_v18 }
  0xf2   : > { %594 = vmatprep.mubr.f32.mxu0 %v2787_v3 }
  0xf5   : > { %2232 = vmatmul.mubr.msk.f32.gmra.mrb[12].mxu0 %vm464_vm2, %v411_v19 }
  0xf6   : > { %600 = vmatprep.mubr.f32.mxu0 %v2787_v3 }
  0xf9   : > { %2233 = vmatmul.mubr.msk.f32.gmra.mrb[14].mxu0 %vm464_vm2, %v412_v20 }
  0xfa   : > { %784 = vmatprep.mubr.f32.mxu0 %v2787_v3 }
 0x15a   : > { %v425_v21 = vpop.permute.xlu0 %424 }
 0x15b   : > { %v435_v31 = vpop.permute.xlu1 %434 }
 0x15e   : > { %v430_v25 = vpop.permute.xlu0 %429 }
 0x15f   : > { %v440_v46 = vpop.permute.xlu1 %439 }
 0x162   : > { %v445_v54 = vpop.permute.xlu0 %444 }
 0x163   : > { %v450_v2 = vpop.permute.xlu1 %449 }
 0x166   : > { %v455_v11 = vpop.permute.xlu0 %454 }
 0x1b0   : > { %v560_v22 = vpop.f32.mrb[0].mxu0 }
 0x1b1   : > { %v561_v23 = vadd.f32 %v560_v22, %v425_v21  ;;  %v562_v24 = vpop.f32.mrb[1].mxu0 }
 0x1b2   : > { %v563_v26 = vadd.f32 %v562_v24, %v425_v21 }
 0x1b3   : > { %v623_v28 = vmul.f32 0.2, %v561_v23  ;;  %vm607_vm3 = vcmp.ge.f32.partialorder %v561_v23, 0.0 }
 0x1b4   : > { %v566_v27 = vpop.f32.mrb[2].mxu0  ;;  %v624_v32 = vmul.f32 0.2, %v563_v26  ;;  %vm608_vm4 = vcmp.ge.f32.partialorder %v563_v26, 0.0 }
 0x1b5   : > { %v567_v29 = vadd.f32 %v566_v27, %v430_v25  ;;  %v568_v30 = vpop.f32.mrb[3].mxu0  ;;  %v639_v37 = vsel %vm607_vm3, %v561_v23, %v623_v28  ;;  %v460_v23 = vpop.permute.xlu1 %459  ;;  %vm671_vm3 = vcmask 523264  }
 0x1b6   : > { %v569_v33 = vadd.f32 %v568_v30, %v430_v25  ;;  %v640_v43 = vsel %vm608_vm4, %v563_v26, %v624_v32  ;;  %vm996_vm4 = vcmask 7168  }
 0x1b7   : > { %vm609_vm5 = vcmp.ge.f32.partialorder %v567_v29, 0.0  ;;  %v625_v34 = vmul.f32 0.2, %v567_v29 }
 0x1b8   : > { %vm610_vm6 = vcmp.ge.f32.partialorder %v569_v33, 0.0  ;;  %v626_v35 = vmul.f32 0.2, %v569_v33  ;;  %v572_v36 = vpop.f32.mrb[4].mxu0 }
 0x1b9   : > { %v641_v38 = vsel %vm609_vm5, %v567_v29, %v625_v34  ;;  %v573_v39 = vadd.f32 %v572_v36, %v435_v31  ;;  %v574_v40 = vpop.f32.mrb[5].mxu0 }
 0x1ba   : > { %v2261_v41 = vpack.c.bf16 %v641_v38, %v639_v37  ;;  %v575_v42 = vadd.f32 %v574_v40, %v435_v31  ;;  %v642_v44 = vsel %vm610_vm6, %v569_v33, %v626_v35  ;;  %v655_v38 = vld [vmem:[#allocation11] sm:$0xff]  ;;  %v656_v40 = vld [vmem:[#allocation11 + $0x8] sm:$0xff] }
 0x1bb   : > { %v2259_v45 = vpack.c.bf16 %v642_v44, %v640_v43  ;;  %v627_v48 = vmul.f32 0.2, %v573_v39  ;;  %vm611_vm7 = vcmp.ge.f32.partialorder %v573_v39, 0.0  ;;  %v662_v43 = vld [vmem:[#allocation11 + $0x38] sm:$0xff]  ;;  %v663_v44 = vld [vmem:[#allocation11 + $0x40] sm:$0xff] }
 0x1bc   : > { %v578_v47 = vpop.f32.mrb[6].mxu0  ;;  %v628_v51 = vmul.f32 0.2, %v575_v42  ;;  %vm612_vm8 = vcmp.ge.f32.partialorder %v575_v42, 0.0 }
 0x1bd   : > { %v579_v49 = vadd.f32 %v578_v47, %v440_v46  ;;  %v580_v50 = vpop.f32.mrb[7].mxu0  ;;  %2260 = vmatprep.subr.bf16.mxu0 %v2259_v45  ;;  %2339 = vmatprep.subr.bf16.mxu1 %v2259_v45  ;;  %v643_v57 = vsel %vm611_vm7, %v573_v39, %v627_v48  ;;  %v660_v39 = vld [vmem:[#allocation11 + $0x28] sm:$0xff]  ;;  %v658_v45 = vld [vmem:[#allocation11 + $0x18] sm:$0xff]  ;;  %v665_v48 = vld [vmem:[#allocation11 + $0x50] sm:$0xff] }
 0x1be   : > { %v581_v52 = vadd.f32 %v580_v50, %v440_v46  ;;  %2262 = vmatpush1.bf16.msra.mxu0 %v2261_v41  ;;  %2343 = vmatpush1.bf16.msra.mxu1 %v2261_v41  ;;  %v644_v63 = vsel %vm612_vm8, %v575_v42, %v628_v51  ;;  %v661_v41 = vld [vmem:[#allocation11 + $0x30] sm:$0xff]  ;;  %v659_v46 = vld [vmem:[#allocation11 + $0x20] sm:$0xff]  ;;  %v664_v47 = vld [vmem:[#allocation11 + $0x48] sm:$0xff] }
 0x1bf   : > { %vm613_vm9 = vcmp.ge.f32.partialorder %v579_v49, 0.0  ;;  %v629_v53 = vmul.f32 0.2, %v579_v49  ;;  %v657_v42 = vld [vmem:[#allocation11 + $0x10] sm:$0xff]  ;;  %v667_v50 = vld [vmem:[#allocation11 + $0x60] sm:$0xff]  ;;  %v668_v51 = vld [vmem:[#allocation11 + $0x68] sm:$0xff] }
 0x1c0   : > { %vm614_vm10 = vcmp.ge.f32.partialorder %v581_v52, 0.0  ;;  %v630_v55 = vmul.f32 0.2, %v581_v52  ;;  %v584_v56 = vpop.f32.mrb[8].mxu0 }
 0x1c1   : > { %v645_v58 = vsel %vm613_vm9, %v579_v49, %v629_v53  ;;  %v585_v59 = vadd.f32 %v584_v56, %v445_v54  ;;  %v586_v60 = vpop.f32.mrb[9].mxu0  ;;  %v666_v49 = vld [vmem:[#allocation11 + $0x58] sm:$0xff] }
 0x1c2   : > { %v2265_v61 = vpack.c.bf16 %v645_v58, %v643_v57  ;;  %v587_v62 = vadd.f32 %v586_v60, %v445_v54  ;;  %v646_v0 = vsel %vm614_vm10, %v581_v52, %v630_v55  ;;  %v669_v52 = vld [vmem:[#allocation11 + $0x70] sm:$0xff]  ;;  %v670_v53 = vld [vmem:[#allocation11 + $0x78] sm:$0xff] }
 0x1c3   : > { %v2263_v1 = vpack.c.bf16 %v646_v0, %v644_v63  ;;  %v631_v5 = vmul.f32 0.2, %v585_v59  ;;  %vm615_vm11 = vcmp.ge.f32.partialorder %v585_v59, 0.0 }
 0x1c4   : > { %v590_v4 = vpop.f32.mrb[10].mxu0  ;;  %v632_v8 = vmul.f32 0.2, %v587_v62  ;;  %vm616_vm12 = vcmp.ge.f32.partialorder %v587_v62, 0.0 }
 0x1c5   : > { %v591_v6 = vadd.f32 %v590_v4, %v450_v2  ;;  %v592_v7 = vpop.f32.mrb[11].mxu0  ;;  %2264 = vmatprep.subr.bf16.mxu0 %v2263_v1  ;;  %2340 = vmatprep.subr.bf16.mxu1 %v2263_v1  ;;  %v647_v14 = vsel %vm615_vm11, %v585_v59, %v631_v5 }
 0x1c6   : > { %v593_v9 = vadd.f32 %v592_v7, %v450_v2  ;;  %2266 = vmatpush1.bf16.msra.mxu0 %v2265_v61  ;;  %2344 = vmatpush1.bf16.msra.mxu1 %v2265_v61  ;;  %v648_v20 = vsel %vm616_vm12, %v587_v62, %v632_v8 }
 0x1c7   : > { %vm617_vm13 = vcmp.ge.f32.partialorder %v591_v6, 0.0  ;;  %v633_v10 = vmul.f32 0.2, %v591_v6 }
 0x1c8   : > { %vm618_vm14 = vcmp.ge.f32.partialorder %v593_v9, 0.0  ;;  %v634_v12 = vmul.f32 0.2, %v593_v9  ;;  %v596_v13 = vpop.f32.mrb[12].mxu0 }
 0x1c9   : > { %v649_v15 = vsel %vm617_vm13, %v591_v6, %v633_v10  ;;  %v597_v16 = vadd.f32 %v596_v13, %v455_v11  ;;  %v598_v17 = vpop.f32.mrb[13].mxu0 }
 0x1ca   : > { %v2269_v18 = vpack.c.bf16 %v649_v15, %v647_v14  ;;  %v599_v19 = vadd.f32 %v598_v17, %v455_v11  ;;  %v650_v21 = vsel %vm618_vm14, %v593_v9, %v634_v12 }
 0x1cb   : > { %v2267_v22 = vpack.c.bf16 %v650_v21, %v648_v20  ;;  %v635_v25 = vmul.f32 0.2, %v597_v16  ;;  %vm619_vm15 = vcmp.ge.f32.partialorder %v597_v16, 0.0 }
 0x1cc   : > { %v602_v24 = vpop.f32.mrb[14].mxu0  ;;  %v636_v28 = vmul.f32 0.2, %v599_v19  ;;  %vm620_vm0 = vcmp.ge.f32.partialorder %v599_v19, 0.0 }
 0x1cd   : > { %v603_v26 = vadd.f32 %v602_v24, %v460_v23  ;;  %v604_v27 = vpop.f32.mrb[15].mxu0  ;;  %2268 = vmatprep.subr.bf16.mxu0 %v2267_v22  ;;  %2341 = vmatprep.subr.bf16.mxu1 %v2267_v22  ;;  %v651_v32 = vsel %vm619_vm15, %v597_v16, %v635_v25 }
 0x1ce   : > { %v605_v29 = vadd.f32 %v604_v27, %v460_v23  ;;  %2270 = vmatpush1.bf16.msra.mxu0 %v2269_v18  ;;  %2345 = vmatpush1.bf16.msra.mxu1 %v2269_v18  ;;  %v652_v35 = vsel %vm620_vm0, %v599_v19, %v636_v28 }
 0x1cf   : > { %vm621_vm1 = vcmp.ge.f32.partialorder %v603_v26, 0.0  ;;  %v637_v30 = vmul.f32 0.2, %v603_v26 }
 0x1d0   : > { %vm622_vm2 = vcmp.ge.f32.partialorder %v605_v29, 0.0  ;;  %v638_v31 = vmul.f32 0.2, %v605_v29 }
 0x1d1   : > { %v653_v33 = vsel %vm621_vm1, %v603_v26, %v637_v30 }
 0x1d2   : > { %v2273_v34 = vpack.c.bf16 %v653_v33, %v651_v32  ;;  %v654_v36 = vsel %vm622_vm2, %v605_v29, %v638_v31 }
 0x1d3   : > { %v2271_v37 = vpack.c.bf16 %v654_v36, %v652_v35 }
 0x1d5   : > { %2272 = vmatprep.subr.bf16.mxu0 %v2271_v37  ;;  %2342 = vmatprep.subr.bf16.mxu1 %v2271_v37 }
 0x1d6   : > { %2274 = vmatpush1.bf16.msra.mxu0 %v2273_v34  ;;  %2346 = vmatpush1.bf16.msra.mxu1 %v2273_v34 }
 0x1d9   : > { %2234 = vmatmul.mubr.msk.f32.vlgmr.msra.gmra.mrb[16].mxu0 %vm671_vm3, %v655_v38  ;;  %2239 = vmatmul.mubr.msk.f32.vlgmr.msra.gmra.mrb[0].mxu1 %vm671_vm3, %v660_v39 }
 0x1da   : > { %790 = vmatprep.mubr.f32.mxu0 %v2787_v3  ;;  %820 = vmatprep.mubr.f32.mxu1 %v2787_v3 }
 0x1dd   : > { %2235 = vmatmul.mubr.msk.f32.gmra.mrb[18].mxu0 %vm671_vm3, %v656_v40  ;;  %2240 = vmatmul.mubr.msk.f32.gmra.mrb[2].mxu1 %vm671_vm3, %v661_v41 }
 0x1de   : > { %796 = vmatprep.mubr.f32.mxu0 %v2787_v3  ;;  %826 = vmatprep.mubr.f32.mxu1 %v2787_v3 }
 0x1e1   : > { %2236 = vmatmul.mubr.msk.f32.gmra.mrb[20].mxu0 %vm671_vm3, %v657_v42  ;;  %2241 = vmatmul.mubr.msk.f32.gmra.mrb[4].mxu1 %vm671_vm3, %v662_v43 }
 0x1e2   : > { %832 = vmatprep.mubr.f32.mxu1 %v2787_v3  ;;  %802 = vmatprep.mubr.f32.mxu0 %v2787_v3 }
 0x1e5   : > { %2242 = vmatmul.mubr.msk.f32.gmra.mrb[6].mxu1 %vm671_vm3, %v663_v44  ;;  %2237 = vmatmul.mubr.msk.f32.gmra.mrb[22].mxu0 %vm671_vm3, %v658_v45 }
 0x1e6   : > { %808 = vmatprep.mubr.f32.mxu0 %v2787_v3  ;;  %838 = vmatprep.mubr.f32.mxu1 %v2787_v3 }
 0x1e9   : > { %2238 = vmatmul.mubr.msk.f32.gmra.mrb[24].mxu0 %vm671_vm3, %v659_v46  ;;  %2243 = vmatmul.mubr.msk.f32.gmra.mrb[8].mxu1 %vm671_vm3, %v664_v47 }
 0x1ea   : > { %844 = vmatprep.mubr.f32.mxu1 %v2787_v3 }
 0x1ed   : > { %2244 = vmatmul.mubr.msk.f32.gmra.mrb[10].mxu1 %vm671_vm3, %v665_v48 }
 0x1ee   : > { %850 = vmatprep.mubr.f32.mxu1 %v2787_v3 }
 0x1f1   : > { %2245 = vmatmul.mubr.msk.f32.gmra.mrb[12].mxu1 %vm671_vm3, %v666_v49 }
 0x1f2   : > { %856 = vmatprep.mubr.f32.mxu1 %v2787_v3 }
 0x1f5   : > { %2246 = vmatmul.mubr.msk.f32.gmra.mrb[14].mxu1 %vm671_vm3, %v667_v50 }
 0x1f6   : > { %862 = vmatprep.mubr.f32.mxu1 %v2787_v3 }
 0x1f9   : > { %2247 = vmatmul.mubr.msk.f32.gmra.mrb[16].mxu1 %vm671_vm3, %v668_v51 }
 0x1fa   : > { %868 = vmatprep.mubr.f32.mxu1 %v2787_v3 }
 0x1fd   : > { %2248 = vmatmul.mubr.msk.f32.gmra.mrb[18].mxu1 %vm671_vm3, %v669_v52 }
 0x1fe   : > { %874 = vmatprep.mubr.f32.mxu1 %v2787_v3 }
 0x201   : > { %2249 = vmatmul.mubr.msk.f32.gmra.mrb[20].mxu1 %vm671_vm3, %v670_v53 }
 0x2ac   : > { %v786_v54 = vpop.f32.mrb[16].mxu0  ;;  %v816_v55 = vpop.f32.mrb[0].mxu1 }
 0x2ad   : > { %884 = vst [vmem:[%s3190_s29] sm:$0xff] %v786_v54  ;;  %v788_v56 = vpop.f32.mrb[17].mxu0  ;;  %894 = vst [vmem:[%s3190_s29 + $0x50] sm:$0xff] %v816_v55  ;;  %v818_v57 = vpop.f32.mrb[1].mxu1  ;;  %v1029_v58 = vmul.f32 %v786_v54, %v786_v54  ;;  %v1039_v3 = vmul.f32 %v816_v55, %v816_v55 }
 0x2ae   : > { %885 = vst [vmem:[%s3190_s29 + $0x8] sm:$0xff] %v788_v56  ;;  %v932_v59 = vadd.f32 %v788_v56, %v786_v54  ;;  %895 = vst [vmem:[%s3190_s29 + $0x58] sm:$0xff] %v818_v57  ;;  %v1030_v60 = vmul.f32 %v788_v56, %v788_v56  ;;  %v947_v61 = vadd.f32 %v818_v57, %v816_v55 }
 0x2af   : > { %v1040_v62 = vmul.f32 %v818_v57, %v818_v57 }
 0x2b0   : > { %933 = vadd.xlane.f32.xlu0 %v932_v59  ;;  %v1061_v63 = vadd.f32 %v1030_v60, %v1029_v58  ;;  %v792_v0 = vpop.f32.mrb[18].mxu0  ;;  %v822_v1 = vpop.f32.mrb[2].mxu1 }
 0x2b1   : > { %v1076_v2 = vadd.f32 %v1040_v62, %v1039_v3  ;;  %886 = vst [vmem:[%s3190_s29 + $0x10] sm:$0xff] %v792_v0  ;;  %v794_v4 = vpop.f32.mrb[19].mxu0  ;;  %896 = vst [vmem:[%s3190_s29 + $0x60] sm:$0xff] %v822_v1  ;;  %v824_v5 = vpop.f32.mrb[3].mxu1  ;;  %v1031_v6 = vmul.f32 %v792_v0, %v792_v0  ;;  %v1041_v7 = vmul.f32 %v822_v1, %v822_v1 }
 0x2b2   : > { %1062 = vadd.xlane.f32.xlu1 %v1061_v63  ;;  %887 = vst [vmem:[%s3190_s29 + $0x18] sm:$0xff] %v794_v4  ;;  %v935_v8 = vadd.f32 %v794_v4, %v792_v0  ;;  %897 = vst [vmem:[%s3190_s29 + $0x68] sm:$0xff] %v824_v5  ;;  %v1032_v9 = vmul.f32 %v794_v4, %v794_v4  ;;  %v950_v10 = vadd.f32 %v824_v5, %v822_v1 }
 0x2b3   : > { %v1042_v11 = vmul.f32 %v824_v5, %v824_v5 }
 0x2b4   : > { %948 = vadd.xlane.f32.xlu0 %v947_v61  ;;  %v1064_v12 = vadd.f32 %v1032_v9, %v1031_v6  ;;  %v798_v13 = vpop.f32.mrb[20].mxu0  ;;  %v828_v14 = vpop.f32.mrb[4].mxu1 }
 0x2b5   : > { %v1079_v15 = vadd.f32 %v1042_v11, %v1041_v7  ;;  %888 = vst [vmem:[%s3190_s29 + $0x20] sm:$0xff] %v798_v13  ;;  %v800_v16 = vpop.f32.mrb[21].mxu0  ;;  %898 = vst [vmem:[%s3190_s29 + $0x70] sm:$0xff] %v828_v14  ;;  %v830_v17 = vpop.f32.mrb[5].mxu1  ;;  %v1033_v18 = vmul.f32 %v798_v13, %v798_v13  ;;  %v1043_v19 = vmul.f32 %v828_v14, %v828_v14 }
 0x2b6   : > { %936 = vadd.xlane.f32.xlu1 %v935_v8  ;;  %889 = vst [vmem:[%s3190_s29 + $0x28] sm:$0xff] %v800_v16  ;;  %v938_v20 = vadd.f32 %v800_v16, %v798_v13  ;;  %899 = vst [vmem:[%s3190_s29 + $0x78] sm:$0xff] %v830_v17  ;;  %v1034_v21 = vmul.f32 %v800_v16, %v800_v16  ;;  %v953_v22 = vadd.f32 %v830_v17, %v828_v14 }
 0x2b7   : > { %v1044_v23 = vmul.f32 %v830_v17, %v830_v17 }
 0x2b8   : > { %1077 = vadd.xlane.f32.xlu0 %v1076_v2  ;;  %v834_v24 = vpop.f32.mrb[6].mxu1  ;;  %v1067_v25 = vadd.f32 %v1034_v21, %v1033_v18  ;;  %v804_v27 = vpop.f32.mrb[22].mxu0 }
 0x2b9   : > { %v1082_v26 = vadd.f32 %v1044_v23, %v1043_v19  ;;  %900 = vst [vmem:[%s3190_s29 + $0x80] sm:$0xff] %v834_v24  ;;  %v836_v28 = vpop.f32.mrb[7].mxu1  ;;  %890 = vst [vmem:[%s3190_s29 + $0x30] sm:$0xff] %v804_v27  ;;  %v806_v29 = vpop.f32.mrb[23].mxu0  ;;  %v1045_v30 = vmul.f32 %v834_v24, %v834_v24  ;;  %v1035_v31 = vmul.f32 %v804_v27, %v804_v27 }
 0x2ba   : > { %951 = vadd.xlane.f32.xlu1 %v950_v10  ;;  %901 = vst [vmem:[%s3190_s29 + $0x88] sm:$0xff] %v836_v28  ;;  %v956_v32 = vadd.f32 %v836_v28, %v834_v24  ;;  %891 = vst [vmem:[%s3190_s29 + $0x38] sm:$0xff] %v806_v29  ;;  %v1046_v33 = vmul.f32 %v836_v28, %v836_v28  ;;  %v941_v34 = vadd.f32 %v806_v29, %v804_v27  ;;  %v1013_v24 = vld [vmem:[#allocation3] sm:$0xff]  ;;  %v921_v27 = vld [vmem:[#allocation2 + $0x28] sm:$0xff] }
 0x2bb   : > { %v1036_v35 = vmul.f32 %v806_v29, %v806_v29 }
 0x2bc   : > { %1065 = vadd.xlane.f32.xlu0 %v1064_v12  ;;  %v1085_v36 = vadd.f32 %v1046_v33, %v1045_v30  ;;  %v810_v37 = vpop.f32.mrb[24].mxu0  ;;  %v840_v38 = vpop.f32.mrb[8].mxu1  ;;  %v917_v30 = vld [vmem:[#allocation2 + $0x8] sm:$0xff] }
 0x2bd   : > { %v1070_v39 = vadd.f32 %v1036_v35, %v1035_v31  ;;  %892 = vst [vmem:[%s3190_s29 + $0x40] sm:$0xff] %v810_v37  ;;  %v812_v40 = vpop.f32.mrb[25].mxu0  ;;  %902 = vst [vmem:[%s3190_s29 + $0x90] sm:$0xff] %v840_v38  ;;  %v842_v41 = vpop.f32.mrb[9].mxu1  ;;  %v1037_v42 = vmul.f32 %v810_v37, %v810_v37  ;;  %v1047_v43 = vmul.f32 %v840_v38, %v840_v38 }
 0x2be   : > { %1080 = vadd.xlane.f32.xlu1 %v1079_v15  ;;  %893 = vst [vmem:[%s3190_s29 + $0x48] sm:$0xff] %v812_v40  ;;  %v1038_v44 = vmul.f32 %v812_v40, %v812_v40  ;;  %v944_v45 = vadd.f32 %v812_v40, %v810_v37  ;;  %903 = vst [vmem:[%s3190_s29 + $0x98] sm:$0xff] %v842_v41  ;;  %v959_v46 = vadd.f32 %v842_v41, %v840_v38  ;;  %v1014_v38 = vld [vmem:[#allocation3 + $0x8] sm:$0xff] }
 0x2bf   : > { %v1048_v47 = vmul.f32 %v842_v41, %v842_v41 }
 0x2c0   : > { %939 = vadd.xlane.f32.xlu0 %v938_v20  ;;  %v846_v48 = vpop.f32.mrb[10].mxu1  ;;  %v1073_v49 = vadd.f32 %v1038_v44, %v1037_v42  ;;  %v1019_v42 = vld [vmem:[#allocation3 + $0x30] sm:$0xff] }
 0x2c1   : > { %v1088_v50 = vadd.f32 %v1048_v47, %v1047_v43  ;;  %904 = vst [vmem:[%s3190_s29 + $0xa0] sm:$0xff] %v846_v48  ;;  %v848_v51 = vpop.f32.mrb[11].mxu1  ;;  %v1049_v52 = vmul.f32 %v846_v48, %v846_v48 }
 0x2c2   : > { %1068 = vadd.xlane.f32.xlu1 %v1067_v25  ;;  %905 = vst [vmem:[%s3190_s29 + $0xa8] sm:$0xff] %v848_v51  ;;  %v962_v53 = vadd.f32 %v848_v51, %v846_v48  ;;  %v1050_v54 = vmul.f32 %v848_v51, %v848_v51  ;;  %v1015_v48 = vld [vmem:[#allocation3 + $0x10] sm:$0xff]  ;;  %v923_v51 = vld [vmem:[#allocation2 + $0x38] sm:$0xff] }
 0x2c4   : > { %954 = vadd.xlane.f32.xlu0 %v953_v22  ;;  %v852_v55 = vpop.f32.mrb[12].mxu1  ;;  %v1091_v56 = vadd.f32 %v1050_v54, %v1049_v52  ;;  %v916_v22 = vld [vmem:[#allocation2] sm:$0xff] }
 0x2c5   : > { %906 = vst [vmem:[%s3190_s29 + $0xb0] sm:$0xff] %v852_v55  ;;  %v854_v57 = vpop.f32.mrb[13].mxu1  ;;  %v1051_v58 = vmul.f32 %v852_v55, %v852_v55  ;;  %v924_v54 = vld [vmem:[#allocation2 + $0x40] sm:$0xff] }
 0x2c6   : > { %957 = vadd.xlane.f32.xlu1 %v956_v32  ;;  %907 = vst [vmem:[%s3190_s29 + $0xb8] sm:$0xff] %v854_v57  ;;  %v965_v3 = vadd.f32 %v854_v57, %v852_v55  ;;  %v1052_v59 = vmul.f32 %v854_v57, %v854_v57  ;;  %v1018_v32 = vld [vmem:[#allocation3 + $0x28] sm:$0xff]  ;;  %v1020_v57 = vld [vmem:[#allocation3 + $0x38] sm:$0xff] }
 0x2c8   : > { %1083 = vadd.xlane.f32.xlu0 %v1082_v26  ;;  %v858_v60 = vpop.f32.mrb[14].mxu1  ;;  %v1094_v61 = vadd.f32 %v1052_v59, %v1051_v58  ;;  %v1021_v59 = vld [vmem:[#allocation3 + $0x40] sm:$0xff] }
 0x2c9   : > { %908 = vst [vmem:[%s3190_s29 + $0xc0] sm:$0xff] %v858_v60  ;;  %v860_v62 = vpop.f32.mrb[15].mxu1  ;;  %v1053_v63 = vmul.f32 %v858_v60, %v858_v60 }
 0x2ca   : > { %1086 = vadd.xlane.f32.xlu1 %v1085_v36  ;;  %909 = vst [vmem:[%s3190_s29 + $0xc8] sm:$0xff] %v860_v62  ;;  %v968_v0 = vadd.f32 %v860_v62, %v858_v60  ;;  %v1054_v1 = vmul.f32 %v860_v62, %v860_v62  ;;  %v922_v36 = vld [vmem:[#allocation2 + $0x30] sm:$0xff]  ;;  %v919_v62 = vld [vmem:[#allocation2 + $0x18] sm:$0xff] }
 0x2cc   : > { %942 = vadd.xlane.f32.xlu0 %v941_v34  ;;  %v864_v2 = vpop.f32.mrb[16].mxu1  ;;  %v1097_v4 = vadd.f32 %v1054_v1, %v1053_v63  ;;  %v920_v1 = vld [vmem:[#allocation2 + $0x20] sm:$0xff] }
 0x2cd   : > { %910 = vst [vmem:[%s3190_s29 + $0xd0] sm:$0xff] %v864_v2  ;;  %v866_v5 = vpop.f32.mrb[17].mxu1  ;;  %v1055_v6 = vmul.f32 %v864_v2, %v864_v2 }
 0x2ce   : > { %945 = vadd.xlane.f32.xlu1 %v944_v45  ;;  %911 = vst [vmem:[%s3190_s29 + $0xd8] sm:$0xff] %v866_v5  ;;  %v971_v7 = vadd.f32 %v866_v5, %v864_v2  ;;  %v1056_v8 = vmul.f32 %v866_v5, %v866_v5  ;;  %v918_v45 = vld [vmem:[#allocation2 + $0x10] sm:$0xff] }
 0x2d0   : > { %1071 = vadd.xlane.f32.xlu0 %v1070_v39  ;;  %v870_v9 = vpop.f32.mrb[18].mxu1  ;;  %v1100_v10 = vadd.f32 %v1056_v8, %v1055_v6  ;;  %v1017_v8 = vld [vmem:[#allocation3 + $0x20] sm:$0xff] }
 0x2d1   : > { %912 = vst [vmem:[%s3190_s29 + $0xe0] sm:$0xff] %v870_v9  ;;  %v872_v11 = vpop.f32.mrb[19].mxu1  ;;  %v1057_v12 = vmul.f32 %v870_v9, %v870_v9 }
 0x2d2   : > { %1074 = vadd.xlane.f32.xlu1 %v1073_v49  ;;  %913 = vst [vmem:[%s3190_s29 + $0xe8] sm:$0xff] %v872_v11  ;;  %v974_v13 = vadd.f32 %v872_v11, %v870_v9  ;;  %v1058_v14 = vmul.f32 %v872_v11, %v872_v11 }
 0x2d4   : > { %960 = vadd.xlane.f32.xlu0 %v959_v46  ;;  %v876_v15 = vpop.f32.mrb[20].mxu1  ;;  %v1103_v16 = vadd.f32 %v1058_v14, %v1057_v12  ;;  %v926_v14 = vld [vmem:[#allocation2 + $0x50] sm:$0xff] }
 0x2d5   : > { %914 = vst [vmem:[%s3190_s29 + $0xf0] sm:$0xff] %v876_v15  ;;  %v878_v17 = vpop.f32.mrb[21].mxu1  ;;  %v1059_v18 = vmul.f32 %v876_v15, %v876_v15 }
 0x2d6   : > { %963 = vadd.xlane.f32.xlu1 %v962_v53  ;;  %915 = vst [vmem:[%s3190_s29 + $0xf8] sm:$0xff] %v878_v17  ;;  %v1060_v19 = vmul.f32 %v878_v17, %v878_v17  ;;  %v977_v20 = vadd.f32 %v878_v17, %v876_v15 }
 0x2d8   : > { %1089 = vadd.xlane.f32.xlu0 %v1088_v50  ;;  %v1106_v21 = vadd.f32 %v1060_v19, %v1059_v18 }
 0x2da   : > { %1092 = vadd.xlane.f32.xlu1 %v1091_v56 }
 0x2dc   : > { %966 = vadd.xlane.f32.xlu0 %v965_v3 }
 0x2de   : > { %969 = vadd.xlane.f32.xlu1 %v968_v0 }
 0x2e0   : > { %1095 = vadd.xlane.f32.xlu0 %v1094_v61 }
 0x2e2   : > { %1098 = vadd.xlane.f32.xlu1 %v1097_v4  ;;  %v1016_v4 = vld [vmem:[#allocation3 + $0x18] sm:$0xff] }
 0x2e4   : > { %972 = vadd.xlane.f32.xlu0 %v971_v7 }
 0x2e6   : > { %975 = vadd.xlane.f32.xlu1 %v974_v13 }
 0x2e8   : > { %1101 = vadd.xlane.f32.xlu0 %v1100_v10  ;;  %v925_v10 = vld [vmem:[#allocation2 + $0x48] sm:$0xff] }
 0x2ea   : > { %1104 = vadd.xlane.f32.xlu1 %v1103_v16  ;;  %v1022_v16 = vld [vmem:[#allocation3 + $0x48] sm:$0xff] }
 0x2ec   : > { %978 = vadd.xlane.f32.xlu0 %v977_v20  ;;  %v1023_v20 = vld [vmem:[#allocation3 + $0x50] sm:$0xff] }
 0x2f0   : > { %1107 = vadd.xlane.f32.xlu0 %v1106_v21 }
 0x33d   : > { %v934_v23 = vpop.xlane.xlu0 %933 }
 0x33e   : > { %v980_v25 = vadd.f32 %v934_v23, %v916_v22  ;;  %v927_v22 = vld [vmem:[#allocation2 + $0x58] sm:$0xff] }
 0x33f   : > { %v1063_v26 = vpop.xlane.xlu1 %1062 }
 0x340   : > { %997 = vst.msk [vmem:[#allocation2] sm:$0xff] %vm996_vm4, %v980_v25  ;;  %v1109_v28 = vadd.f32 %v1063_v26, %v1013_v24  ;;  %v928_v26 = vld [vmem:[#allocation2 + $0x60] sm:$0xff] }
 0x341   : > { %v949_v29 = vpop.xlane.xlu0 %948 }
 0x342   : > { %1125 = vst.msk [vmem:[#allocation3] sm:$0xff] %vm996_vm4, %v1109_v28  ;;  %v985_v31 = vadd.f32 %v949_v29, %v921_v27  ;;  %v1024_v28 = vld [vmem:[#allocation3 + $0x58] sm:$0xff] }
 0x343   : > { %v937_v33 = vpop.xlane.xlu1 %936 }
 0x344   : > { %1002 = vst.msk [vmem:[#allocation2 + $0x28] sm:$0xff] %vm996_vm4, %v985_v31  ;;  %v981_v34 = vadd.f32 %v937_v33, %v917_v30 }
 0x345   : > { %v1078_v35 = vpop.xlane.xlu0 %1077 }
 0x346   : > { %v1114_v37 = vadd.f32 %v1078_v35, %v1018_v32  ;;  %998 = vst.msk [vmem:[#allocation2 + $0x8] sm:$0xff] %vm996_vm4, %v981_v34  ;;  %v1025_v32 = vld [vmem:[#allocation3 + $0x60] sm:$0xff]  ;;  %v929_v34 = vld [vmem:[#allocation2 + $0x68] sm:$0xff] }
 0x347   : > { %v952_v39 = vpop.xlane.xlu1 %951 }
 0x348   : > { %1130 = vst.msk [vmem:[#allocation3 + $0x28] sm:$0xff] %vm996_vm4, %v1114_v37  ;;  %v986_v40 = vadd.f32 %v952_v39, %v922_v36 }
 0x349   : > { %v1066_v41 = vpop.xlane.xlu0 %1065 }
 0x34a   : > { %v1110_v43 = vadd.f32 %v1066_v41, %v1014_v38  ;;  %1003 = vst.msk [vmem:[#allocation2 + $0x30] sm:$0xff] %vm996_vm4, %v986_v40  ;;  %v930_v38 = vld [vmem:[#allocation2 + $0x70] sm:$0xff]  ;;  %v1026_v40 = vld [vmem:[#allocation3 + $0x68] sm:$0xff] }
 0x34b   : > { %v1081_v44 = vpop.xlane.xlu1 %1080 }
 0x34c   : > { %1126 = vst.msk [vmem:[#allocation3 + $0x8] sm:$0xff] %vm996_vm4, %v1110_v43  ;;  %v1115_v46 = vadd.f32 %v1081_v44, %v1019_v42  ;;  %v1027_v44 = vld [vmem:[#allocation3 + $0x70] sm:$0xff] }
 0x34d   : > { %v940_v47 = vpop.xlane.xlu0 %939 }
 0x34e   : > { %1131 = vst.msk [vmem:[#allocation3 + $0x30] sm:$0xff] %vm996_vm4, %v1115_v46  ;;  %v982_v49 = vadd.f32 %v940_v47, %v918_v45  ;;  %v931_v46 = vld [vmem:[#allocation2 + $0x78] sm:$0xff] }
 0x34f   : > { %v1069_v50 = vpop.xlane.xlu1 %1068 }
 0x350   : > { %999 = vst.msk [vmem:[#allocation2 + $0x10] sm:$0xff] %vm996_vm4, %v982_v49  ;;  %v1111_v52 = vadd.f32 %v1069_v50, %v1015_v48 }
 0x351   : > { %v955_v53 = vpop.xlane.xlu0 %954 }
 0x352   : > { %1127 = vst.msk [vmem:[#allocation3 + $0x10] sm:$0xff] %vm996_vm4, %v1111_v52  ;;  %v987_v55 = vadd.f32 %v955_v53, %v923_v51  ;;  %v1028_v51 = vld [vmem:[#allocation3 + $0x78] sm:$0xff] }
 0x353   : > { %v958_v56 = vpop.xlane.xlu1 %957 }
 0x354   : > { %1004 = vst.msk [vmem:[#allocation2 + $0x38] sm:$0xff] %vm996_vm4, %v987_v55  ;;  %v988_v58 = vadd.f32 %v958_v56, %v924_v54  ;;  %v2789_v56 = vmov (!%p2252_p5), 0  }
 0x355   : > { %v1084_v3 = vpop.xlane.xlu0 %1083  ;;  %2468 = vset.pattern.permute.xlu1 (!%p2252_p5), %v2789_v56  ;;  %2467 = vset.pattern.permute.xlu0 (!%p2252_p5), %v2789_v56 }
 0x356   : > { %1005 = vst.msk [vmem:[#allocation2 + $0x40] sm:$0xff] %vm996_vm4, %v988_v58  ;;  %v1116_v60 = vadd.f32 %v1084_v3, %v1020_v57  ;;  %v1145_v3 = vld [vmem:[#allocation2] sm:$0xff] (!%p2252_p5) }
 0x357   : > { %v1087_v61 = vpop.xlane.xlu1 %1086 }
 0x358   : > { %1132 = vst.msk [vmem:[#allocation3 + $0x38] sm:$0xff] %vm996_vm4, %v1116_v60  ;;  %v1117_v63 = vadd.f32 %v1087_v61, %v1021_v59  ;;  %v1177_v59 = vld [vmem:[#allocation3] sm:$0xff] (!%p2252_p5)  ;;  %v3259_v60 = vmul.f32 (!%p2252_p5), 0.001953125, %v1145_v3 }
 0x359   : > { %v943_v0 = vpop.xlane.xlu0 %942  ;;  %v1193_v61 = vmul.f32 (!%p2252_p5), 0.001953125, %v1177_v59  ;;  %v1274_v59 = vld [vmem:[#allocation13 + $0x8] sm:$0xff] (!%p2252_p5) }
 0x35a   : > { %1133 = vst.msk [vmem:[#allocation3 + $0x40] sm:$0xff] %vm996_vm4, %v1117_v63  ;;  %v983_v2 = vadd.f32 %v943_v0, %v919_v62  ;;  %v1150_v62 = vld [vmem:[#allocation2 + $0x28] sm:$0xff] (!%p2252_p5) }
 0x35b   : > { %v946_v5 = vpop.xlane.xlu1 %945  ;;  %v1182_v63 = vld [vmem:[#allocation3 + $0x28] sm:$0xff] (!%p2252_p5) }
 0x35c   : > { %1000 = vst.msk [vmem:[#allocation2 + $0x18] sm:$0xff] %vm996_vm4, %v983_v2  ;;  %v984_v6 = vadd.f32 %v946_v5, %v920_v1  ;;  %v3263_v1 = vmul.f32 (!%p2252_p5), 0.001953125, %v1150_v62  ;;  %v1198_v2 = vmul.f32 (!%p2252_p5), 0.001953125, %v1182_v63  ;;  %v1178_v5 = vld [vmem:[#allocation3 + $0x8] sm:$0xff] (!%p2252_p5) }
 0x35d   : > { %v1072_v7 = vpop.xlane.xlu0 %1071 }
 0x35e   : > { %v1112_v9 = vadd.f32 %v1072_v7, %v1016_v4  ;;  %1001 = vst.msk [vmem:[#allocation2 + $0x20] sm:$0xff] %vm996_vm4, %v984_v6  ;;  %v1146_v4 = vld [vmem:[#allocation2 + $0x8] sm:$0xff] (!%p2252_p5)  ;;  %v1209_v6 = vmul.f32 (!%p2252_p5), %v3259_v60, %v3259_v60 }
 0x35f   : > { %v1075_v11 = vpop.xlane.xlu1 %1074  ;;  %v3267_v7 = vmul.f32 (!%p2252_p5), 0.001953125, %v1146_v4 }
 0x360   : > { %1128 = vst.msk [vmem:[#allocation3 + $0x18] sm:$0xff] %vm996_vm4, %v1112_v9  ;;  %v1113_v12 = vadd.f32 %v1075_v11, %v1017_v8  ;;  %v1194_v8 = vmul.f32 (!%p2252_p5), 0.001953125, %v1178_v5  ;;  %v1152_v9 = vld [vmem:[#allocation2 + $0x38] sm:$0xff] (!%p2252_p5) }
 0x361   : > { %v961_v13 = vpop.xlane.xlu0 %960  ;;  %v1185_v56 = vld [vmem:[#allocation3 + $0x40] sm:$0xff] (!%p2252_p5) }
 0x362   : > { %v989_v15 = vadd.f32 %v961_v13, %v925_v10  ;;  %1129 = vst.msk [vmem:[#allocation3 + $0x20] sm:$0xff] %vm996_vm4, %v1113_v12  ;;  %v1184_v10 = vld [vmem:[#allocation3 + $0x38] sm:$0xff] (!%p2252_p5)  ;;  %v1214_v12 = vmul.f32 (!%p2252_p5), %v3263_v1, %v3263_v1  ;;  %v3271_v13 = vmul.f32 (!%p2252_p5), 0.001953125, %v1152_v9  ;;  %v1201_v5 = vmul.f32 (!%p2252_p5), 0.001953125, %v1185_v56  ;;  %v1307_v56 = vld [vmem:[#allocation14 + $0x10] sm:$0xff] (!%p2252_p5) }
 0x363   : > { %v964_v17 = vpop.xlane.xlu1 %963  ;;  %v1148_v54 = vld [vmem:[#allocation2 + $0x18] sm:$0xff] (!%p2252_p5) }
 0x364   : > { %1006 = vst.msk [vmem:[#allocation2 + $0x48] sm:$0xff] %vm996_vm4, %v989_v15  ;;  %v990_v18 = vadd.f32 %v964_v17, %v926_v14  ;;  %v3257_v57 = vmul.f32 (!%p2252_p5), 0.001953125, %v1148_v54  ;;  %v1200_v14 = vmul.f32 (!%p2252_p5), 0.001953125, %v1184_v10  ;;  %v1147_v15 = vld [vmem:[#allocation2 + $0x10] sm:$0xff] (!%p2252_p5)  ;;  %v1225_v17 = vsub.f32 (!%p2252_p5), %v1193_v61, %v1209_v6 }
 0x365   : > { %v1090_v19 = vpop.xlane.xlu0 %1089 }
 0x366   : > { %v1118_v21 = vadd.f32 %v1090_v19, %v1022_v16  ;;  %1007 = vst.msk [vmem:[#allocation2 + $0x50] sm:$0xff] %vm996_vm4, %v990_v18  ;;  %v1212_v0 = vmul.f32 (!%p2252_p5), %v3257_v57, %v3257_v57  ;;  %v1179_v16 = vld [vmem:[#allocation3 + $0x10] sm:$0xff] (!%p2252_p5)  ;;  %v1210_v18 = vmul.f32 (!%p2252_p5), %v3267_v7, %v3267_v7  ;;  %v3275_v19 = vmul.f32 (!%p2252_p5), 0.001953125, %v1147_v15  ;;  %v1275_v15 = vld [vmem:[#allocation13 + $0x10] sm:$0xff] (!%p2252_p5) }
 0x367   : > { %v1093_v23 = vpop.xlane.xlu1 %1092  ;;  %v1180_v55 = vld [vmem:[#allocation3 + $0x18] sm:$0xff] (!%p2252_p5) }
 0x368   : > { %1134 = vst.msk [vmem:[#allocation3 + $0x48] sm:$0xff] %vm996_vm4, %v1118_v21  ;;  %v1119_v24 = vadd.f32 %v1093_v23, %v1023_v20  ;;  %v1196_v58 = vmul.f32 (!%p2252_p5), 0.001953125, %v1180_v55  ;;  %v1195_v20 = vmul.f32 (!%p2252_p5), 0.001953125, %v1179_v16  ;;  %v1149_v21 = vld [vmem:[#allocation2 + $0x20] sm:$0xff] (!%p2252_p5)  ;;  %v1278_v55 = vld [vmem:[#allocation13 + $0x28] sm:$0xff] (!%p2252_p5) }
 0x369   : > { %v967_v25 = vpop.xlane.xlu0 %966 }
 0x36a   : > { %v991_v27 = vadd.f32 %v967_v25, %v927_v22  ;;  %1135 = vst.msk [vmem:[#allocation3 + $0x50] sm:$0xff] %vm996_vm4, %v1119_v24  ;;  %v1228_v11 = vsub.f32 (!%p2252_p5), %v1196_v58, %v1212_v0  ;;  %v1181_v22 = vld [vmem:[#allocation3 + $0x20] sm:$0xff] (!%p2252_p5)  ;;  %v1230_v24 = vsub.f32 (!%p2252_p5), %v1198_v2, %v1214_v12  ;;  %v1216_v25 = vmul.f32 (!%p2252_p5), %v3271_v13, %v3271_v13 }
 0x36b   : > { %v970_v29 = vpop.xlane.xlu1 %969 }
 0x36c   : > { %1008 = vst.msk [vmem:[#allocation2 + $0x58] sm:$0xff] %vm996_vm4, %v991_v27  ;;  %v992_v30 = vadd.f32 %v970_v29, %v928_v26  ;;  %v1244_v23 = vadd.f32 (!%p2252_p5), 1e-05, %v1228_v11  ;;  %v3279_v26 = vmul.f32 (!%p2252_p5), 0.001953125, %v1149_v21  ;;  %v1151_v27 = vld [vmem:[#allocation2 + $0x30] sm:$0xff] (!%p2252_p5)  ;;  %v1226_v29 = vsub.f32 (!%p2252_p5), %v1194_v8, %v1210_v18  ;;  %v1280_v11 = vld [vmem:[#allocation13 + $0x38] sm:$0xff] (!%p2252_p5) }
 0x36d   : > { %v1096_v31 = vpop.xlane.xlu0 %1095  ;;  %v1155_v12 = vld [vmem:[#allocation2 + $0x50] sm:$0xff] (!%p2252_p5) }
 0x36e   : > { %v1120_v33 = vadd.f32 %v1096_v31, %v1024_v28  ;;  %1009 = vst.msk [vmem:[#allocation2 + $0x60] sm:$0xff] %vm996_vm4, %v992_v30  ;;  %v1241_v28 = vadd.f32 (!%p2252_p5), 1e-05, %v1225_v17  ;;  %v1211_v30 = vmul.f32 (!%p2252_p5), %v3275_v19, %v3275_v19  ;;  %v1197_v31 = vmul.f32 (!%p2252_p5), 0.001953125, %v1181_v22 }
 0x36f   : > { %v1099_v35 = vpop.xlane.xlu1 %1098  ;;  %2469 = vrsqrt.f32 (!%p2252_p5), %v1244_v23  ;;  %v3305_v22 = vmul.f32 (!%p2252_p5), 0.001953125, %v1155_v12 }
 0x370   : > { %1136 = vst.msk [vmem:[#allocation3 + $0x58] sm:$0xff] %vm996_vm4, %v1120_v33  ;;  %v1121_v36 = vadd.f32 %v1099_v35, %v1025_v32  ;;  %v1183_v32 = vld [vmem:[#allocation3 + $0x30] sm:$0xff] (!%p2252_p5)  ;;  %v1246_v33 = vadd.f32 (!%p2252_p5), 1e-05, %v1230_v24  ;;  %v1213_v35 = vmul.f32 (!%p2252_p5), %v3279_v26, %v3279_v26  ;;  %2471 = vrsqrt.f32 (!%p2252_p5), %v1241_v28 }
 0x371   : > { %v973_v37 = vpop.xlane.xlu0 %972  ;;  %v1187_v23 = vld [vmem:[#allocation3 + $0x50] sm:$0xff] (!%p2252_p5) }
 0x372   : > { %v993_v39 = vadd.f32 %v973_v37, %v929_v34  ;;  %1137 = vst.msk [vmem:[#allocation3 + $0x60] sm:$0xff] %vm996_vm4, %v1121_v36  ;;  %v1232_v34 = vsub.f32 (!%p2252_p5), %v1200_v14, %v1216_v25  ;;  %v1242_v36 = vadd.f32 (!%p2252_p5), 1e-05, %v1226_v29  ;;  %v1227_v37 = vsub.f32 (!%p2252_p5), %v1195_v20, %v1211_v30  ;;  %v1277_v29 = vld [vmem:[#allocation13 + $0x20] sm:$0xff] (!%p2252_p5) }
 0x373   : > { %v976_v41 = vpop.xlane.xlu1 %975  ;;  %2473 = vrsqrt.f32 (!%p2252_p5), %v1246_v33  ;;  %v1156_v8 = vld [vmem:[#allocation2 + $0x58] sm:$0xff] (!%p2252_p5) }
 0x374   : > { %1010 = vst.msk [vmem:[#allocation2 + $0x68] sm:$0xff] %vm996_vm4, %v993_v39  ;;  %v994_v42 = vadd.f32 %v976_v41, %v930_v38  ;;  %v3285_v38 = vmul.f32 (!%p2252_p5), 0.001953125, %v1151_v27  ;;  %v1248_v39 = vadd.f32 (!%p2252_p5), 1e-05, %v1232_v34  ;;  %v1199_v41 = vmul.f32 (!%p2252_p5), 0.001953125, %v1183_v32  ;;  %v1305_v27 = vld [vmem:[#allocation14] sm:$0xff] (!%p2252_p5) }
 0x375   : > { %v1102_v43 = vpop.xlane.xlu0 %1101  ;;  %2475 = vrsqrt.f32 (!%p2252_p5), %v1242_v36  ;;  %v3299_v17 = vmul.f32 (!%p2252_p5), 0.001953125, %v1156_v8  ;;  %v1219_v36 = vmul.f32 (!%p2252_p5), %v3305_v22, %v3305_v22 }
 0x376   : > { %v1122_v45 = vadd.f32 %v1102_v43, %v1026_v40  ;;  %1011 = vst.msk [vmem:[#allocation2 + $0x70] sm:$0xff] %vm996_vm4, %v994_v42  ;;  %v1229_v40 = vsub.f32 (!%p2252_p5), %v1197_v31, %v1213_v35  ;;  %v1243_v42 = vadd.f32 (!%p2252_p5), 1e-05, %v1227_v37  ;;  %v1215_v43 = vmul.f32 (!%p2252_p5), %v3285_v38, %v3285_v38  ;;  %v1157_v37 = vld [vmem:[#allocation2 + $0x60] sm:$0xff] (!%p2252_p5) }
 0x377   : > { %v1105_v47 = vpop.xlane.xlu1 %1104  ;;  %2477 = vrsqrt.f32 (!%p2252_p5), %v1248_v39  ;;  %v1188_v24 = vld [vmem:[#allocation3 + $0x58] sm:$0xff] (!%p2252_p5)  ;;  %v1203_v31 = vmul.f32 (!%p2252_p5), 0.001953125, %v1187_v23 }
 0x378   : > { %1138 = vst.msk [vmem:[#allocation3 + $0x68] sm:$0xff] %vm996_vm4, %v1122_v45  ;;  %v1123_v48 = vadd.f32 %v1105_v47, %v1027_v44  ;;  %2479 = vrsqrt.f32 (!%p2252_p5), %v1243_v42  ;;  %v1245_v44 = vadd.f32 (!%p2252_p5), 1e-05, %v1229_v40  ;;  %v1231_v45 = vsub.f32 (!%p2252_p5), %v1199_v41, %v1215_v43  ;;  %v1153_v47 = vld [vmem:[#allocation2 + $0x40] sm:$0xff] (!%p2252_p5)  ;;  %v1306_v41 = vld [vmem:[#allocation14 + $0x8] sm:$0xff] (!%p2252_p5) }
 0x379   : > { %v979_v49 = vpop.xlane.xlu0 %978  ;;  %v2470_v54 = vpop.eup (!%p2252_p5), %2469  ;;  %v1204_v32 = vmul.f32 (!%p2252_p5), 0.001953125, %v1188_v24  ;;  %v1279_v43 = vld [vmem:[#allocation13 + $0x30] sm:$0xff] (!%p2252_p5)  ;;  %v1282_v23 = vld [vmem:[#allocation13 + $0x48] sm:$0xff] (!%p2252_p5) }
 0x37a   : > { %v995_v50 = vadd.f32 %v979_v49, %v931_v46  ;;  %1139 = vst.msk [vmem:[#allocation3 + $0x70] sm:$0xff] %vm996_vm4, %v1123_v48  ;;  %1144 = sbr.rel (%p2252_p5) target bundleno = 1342 (0x53e), region = 84  ;;  %v1154_v46 = vld [vmem:[#allocation2 + $0x48] sm:$0xff] (!%p2252_p5)  ;;  %2481 = vrsqrt.f32 (!%p2252_p5), %v1245_v44  ;;  %v2472_v58 = vpop.eup (!%p2252_p5), %2471 }
 0x37b   : > { %v1276_v48 = vld [vmem:[#allocation13 + $0x18] sm:$0xff] (!%p2252_p5)  ;;  %v3289_v49 = vmul.f32 (!%p2252_p5), 0.001953125, %v1154_v46  ;;  %v1189_v46 = vld [vmem:[#allocation3 + $0x60] sm:$0xff] (!%p2252_p5) }
 0x37c   : > { %1012 = vst.msk [vmem:[#allocation2 + $0x78] sm:$0xff] %vm996_vm4, %v995_v50  ;;  %v1273_v50 = vld [vmem:[#allocation13] sm:$0xff] (!%p2252_p5)  ;;  %v1292_v3 = vmul.f32 (!%p2252_p5), %v2470_v54, %v1276_v48  ;;  %v1158_v39 = vld [vmem:[#allocation2 + $0x68] sm:$0xff] (!%p2252_p5) }
 0x37d   : > { %v1108_v52 = vpop.xlane.xlu0 %1107  ;;  %v2474_v61 = vpop.eup (!%p2252_p5), %2473  ;;  %v1289_v62 = vmul.f32 (!%p2252_p5), %v2472_v58, %v1273_v50  ;;  %v1218_v0 = vmul.f32 (!%p2252_p5), %v3289_v49, %v3289_v49  ;;  %v1235_v50 = vsub.f32 (!%p2252_p5), %v1203_v31, %v1219_v36  ;;  %v1205_v58 = vmul.f32 (!%p2252_p5), 0.001953125, %v1189_v46  ;;  %v1159_v8 = vld [vmem:[#allocation2 + $0x70] sm:$0xff] (!%p2252_p5)  ;;  %v1283_v46 = vld [vmem:[#allocation13 + $0x50] sm:$0xff] (!%p2252_p5) }
 0x37e   : > { %v1124_v53 = vadd.f32 %v1108_v52, %v1028_v51  ;;  %v1247_v51 = vadd.f32 (!%p2252_p5), 1e-05, %v1231_v45  ;;  %v3291_v52 = vmul.f32 (!%p2252_p5), 0.001953125, %v1153_v47  ;;  %1402 = vperm.xlu1 (!%p2252_p5), %2468, %v1292_v3   ;;  %v3295_v4 = vmul.f32 (!%p2252_p5), %v2474_v61, %v1278_v55  ;;  %v1308_v55 = vld [vmem:[#allocation14 + $0x18] sm:$0xff] (!%p2252_p5) }
 0x37f   : > { %v2476_v2 = vpop.eup (!%p2252_p5), %2475  ;;  %1387 = vperm.xlu0 (!%p2252_p5), %2467, %v1289_v62   ;;  %v1321_v18 = vmul.f32 (!%p2252_p5), %v1289_v62, %v3259_v60  ;;  %v1220_v60 = vmul.f32 (!%p2252_p5), %v3299_v17, %v3299_v17  ;;  %v3313_v45 = vmul.f32 (!%p2252_p5), 0.001953125, %v1157_v37  ;;  %v3315_v47 = vmul.f32 (!%p2252_p5), 0.001953125, %v1158_v39 }
 0x380   : > { %1140 = vst.msk [vmem:[#allocation3 + $0x78] sm:$0xff] %vm996_vm4, %v1124_v53  ;;  %v1186_v53 = vld [vmem:[#allocation3 + $0x48] sm:$0xff] (!%p2252_p5)  ;;  %2483 = vrsqrt.f32 (!%p2252_p5), %v1247_v51  ;;  %v1217_v6 = vmul.f32 (!%p2252_p5), %v3291_v52, %v3291_v52  ;;  %v1290_v10 = vmul.f32 (!%p2252_p5), %v2476_v2, %v1274_v59 }
 0x381   : > { %v1202_v63 = vmul.f32 0.001953125, %v1186_v53  ;;  %v2478_v9 = vpop.eup %2477  ;;  %v1337_v33 = vsub.f32 %v1305_v27, %v1321_v18  ;;  %v1236_v44 = vsub.f32 %v1204_v32, %v1220_v60  ;;  %v1190_v51 = vld [vmem:[#allocation3 + $0x68] sm:$0xff]  ;;  %v1221_v61 = vmul.f32 %v3313_v45, %v3313_v45  ;;  %v1191_v24 = vld [vmem:[#allocation3 + $0x70] sm:$0xff]  ;;  %v1311_v27 = vld [vmem:[#allocation14 + $0x30] sm:$0xff] }
 0x382   : > { %v2480_v14 = vpop.eup %2479  ;;  %1412 = vperm.xlu1 %2468, %v3295_v4   ;;  %v3303_v20 = vmul.f32 %v2478_v9, %v1280_v11  ;;  %v1233_v21 = vsub.f32 %v1201_v5, %v1217_v6  ;;  %v1322_v34 = vmul.f32 %v1290_v10, %v3267_v7  ;;  %v1324_v7 = vmul.f32 %v1292_v3, %v3257_v57  ;;  %v1310_v6 = vld [vmem:[#allocation14 + $0x28] sm:$0xff]  ;;  %v1309_v9 = vld [vmem:[#allocation14 + $0x20] sm:$0xff] }
 0x383   : > { %v1234_v16 = vsub.f32 %v1202_v63, %v1218_v0  ;;  %1392 = vperm.xlu0 %2467, %v1290_v10   ;;  %v1291_v25 = vmul.f32 %v2480_v14, %v1275_v15  ;;  %v1252_v59 = vadd.f32 1e-05, %v1236_v44  ;;  %v1206_v62 = vmul.f32 0.001953125, %v1190_v51  ;;  %v1160_v2 = vld [vmem:[#allocation2 + $0x78] sm:$0xff]  ;;  %v1313_v44 = vld [vmem:[#allocation14 + $0x40] sm:$0xff] }
 0x384   : > { %v2482_v28 = vpop.eup %2481  ;;  %v1249_v35 = vadd.f32 1e-05, %v1233_v21  ;;  %v1338_v48 = vsub.f32 %v1306_v41, %v1322_v34  ;;  %v1222_v57 = vmul.f32 %v3315_v47, %v3315_v47  ;;  %v1340_v3 = vsub.f32 %v1308_v55, %v1324_v7  ;;  %v1312_v21 = vld [vmem:[#allocation14 + $0x38] sm:$0xff]  ;;  %v1314_v41 = vld [vmem:[#allocation14 + $0x48] sm:$0xff] }
 0x385   : > { %v1250_v30 = vadd.f32 1e-05, %v1234_v16  ;;  %v1293_v40 = vmul.f32 %v2482_v28, %v1277_v29  ;;  %v1323_v54 = vmul.f32 %v1291_v25, %v3275_v19  ;;  %v1326_v63 = vmul.f32 %v3295_v4, %v3263_v1  ;;  %v1281_v28 = vld [vmem:[#allocation13 + $0x40] sm:$0xff] }
 0x386   : > { %1422 = vperm.xlu1 %2468, %v3303_v20   ;;  %v1251_v0 = vadd.f32 1e-05, %v1235_v50  ;;  %v1237_v10 = vsub.f32 %v1205_v58, %v1221_v61  ;;  %v1238_v11 = vsub.f32 %v1206_v62, %v1222_v57  ;;  %v3326_v12 = vmul.f32 0.001953125, %v1160_v2  ;;  %v1286_v58 = vld [vmem:[#allocation13 + $0x68] sm:$0xff]  ;;  %v1315_v61 = vld [vmem:[#allocation14 + $0x50] sm:$0xff]  ;;  %v1285_v62 = vld [vmem:[#allocation13 + $0x60] sm:$0xff] }
 0x387   : > { %1397 = vperm.xlu0 %2467, %v1291_v25   ;;  %2485 = vrsqrt.f32 %v1250_v30  ;;  %v1339_v19 = vsub.f32 %v1307_v56, %v1323_v54  ;;  %v1325_v5 = vmul.f32 %v1293_v40, %v3279_v26  ;;  %v1342_v14 = vsub.f32 %v1310_v6, %v1326_v63  ;;  %v1192_v4 = vld [vmem:[#allocation3 + $0x78] sm:$0xff]  ;;  %v1316_v56 = vld [vmem:[#allocation14 + $0x58] sm:$0xff] }
 0x388   : > { %2487 = vrsqrt.f32 %v1249_v35  ;;  %v1328_v15 = vmul.f32 %v3303_v20, %v3271_v13  ;;  %v3330_v1 = vmul.f32 0.001953125, %v1159_v8  ;;  %v1253_v29 = vadd.f32 1e-05, %v1237_v10  ;;  %v1317_v8 = vld [vmem:[#allocation14 + $0x60] sm:$0xff] }
 0x389   : > { %2489 = vrsqrt.f32 %v1252_v59  ;;  %v1341_v26 = vsub.f32 %v1309_v9, %v1325_v5  ;;  %v1254_v30 = vadd.f32 1e-05, %v1238_v11  ;;  %v1208_v31 = vmul.f32 0.001953125, %v1192_v4  ;;  %v1318_v5 = vld [vmem:[#allocation14 + $0x68] sm:$0xff]  ;;  %v1287_v9 = vld [vmem:[#allocation13 + $0x70] sm:$0xff] }
 0x38a   : > { %v2484_v42 = vpop.eup %2483  ;;  %1499 = vperm.xlu1 %2468, %v1337_v33   ;;  %2491 = vrsqrt.f32 %v1251_v0  ;;  %v1224_v13 = vmul.f32 %v3326_v12, %v3326_v12  ;;  %v1344_v20 = vsub.f32 %v1312_v21, %v1328_v15  ;;  %v1207_v60 = vmul.f32 0.001953125, %v1191_v24 }
 0x38b   : > { %1407 = vperm.xlu0 %2467, %v1293_v40   ;;  %v1295_v53 = vmul.f32 %v2484_v42, %v1279_v43  ;;  %v1223_v33 = vmul.f32 %v3330_v1, %v3330_v1  ;;  %2493 = vrsqrt.f32 %v1254_v30  ;;  %v1284_v42 = vld [vmem:[#allocation13 + $0x58] sm:$0xff]  ;;  %v2790_v21 = vmov 0.0  }
 0x38c   : > { %v1240_v35 = vsub.f32 %v1208_v31, %v1224_v13  ;;  %2495 = vrsqrt.f32 %v1253_v29  ;;  %1770 = vmatprep.mubr.f32.mxu0 %v2790_v21  ;;  %2058 = vmatprep.mubr.f32.mxu1 %v2790_v21  ;;  %v1353_v29 = vld [vmem:[#allocation4] sm:$0xff]  ;;  %v1354_v30 = vld [vmem:[#allocation4 + $0x8] sm:$0xff]  ;;  %v1363_v13 = vld [vmem:[#allocation4 + $0x50] sm:$0xff] }
 0x38d   : > { %v1327_v18 = vmul.f32 %v1295_v53, %v3285_v38  ;;  %v1239_v37 = vsub.f32 %v1207_v60, %v1223_v33  ;;  %v1802_v31 = vld [vmem:[#allocation4 + $0x108] sm:$0xff]  ;;  %v1811_v60 = vld [vmem:[#allocation4 + $0x150] sm:$0xff]  ;;  %v1812_v33 = vld [vmem:[#allocation4 + $0x158] sm:$0xff] }
 0x38e   : > { %1504 = vperm.xlu1 %2468, %v1338_v48   ;;  %v1256_v7 = vadd.f32 1e-05, %v1240_v35  ;;  %v1356_v35 = vld [vmem:[#allocation4 + $0x18] sm:$0xff] }
 0x38f   : > { %1417 = vperm.xlu0 %2467, %v1295_v53   ;;  %v1343_v38 = vsub.f32 %v1311_v27, %v1327_v18  ;;  %v1255_v51 = vadd.f32 1e-05, %v1239_v37  ;;  %v1360_v27 = vld [vmem:[#allocation4 + $0x38] sm:$0xff] }
 0x390   : > { %2497 = vrsqrt.f32 %v1256_v7 }
 0x391   : > { %v2486_v16 = vpop.eup %2485  ;;  %2499 = vrsqrt.f32 %v1255_v51  ;;  %v1815_v51 = vld [vmem:[#allocation4 + $0x170] sm:$0xff] }
 0x392   : > { %1514 = vperm.xlu1 %2468, %v1340_v3   ;;  %v2488_v25 = vpop.eup %2487  ;;  %v1298_v32 = vmul.f32 %v2486_v16, %v1282_v23  ;;  %v1320_v16 = vld [vmem:[#allocation14 + $0x78] sm:$0xff] }
 0x393   : > { %1509 = vperm.xlu0 %2467, %v1339_v19   ;;  %v1297_v34 = vmul.f32 %v2488_v25, %v1281_v28  ;;  %v2490_v39 = vpop.eup %2489  ;;  %v1359_v25 = vld [vmem:[#allocation4 + $0x30] sm:$0xff] }
 0x394   : > { %v1330_v36 = vmul.f32 %v1298_v32, %v3289_v49  ;;  %v2492_v43 = vpop.eup %2491  ;;  %v1300_v50 = vmul.f32 %v2490_v39, %v1284_v42  ;;  %v1807_v28 = vld [vmem:[#allocation4 + $0x130] sm:$0xff]  ;;  %v1804_v42 = vld [vmem:[#allocation4 + $0x118] sm:$0xff] }
 0x395   : > { %v1329_v40 = vmul.f32 %v1297_v34, %v3291_v52  ;;  %v1299_v54 = vmul.f32 %v2492_v43, %v1283_v46  ;;  %v2494_v55 = vpop.eup %2493  ;;  %v1367_v43 = vld [vmem:[#allocation4 + $0x70] sm:$0xff] }
 0x396   : > { %1524 = vperm.xlu1 %2468, %v1342_v14   ;;  %v1346_v48 = vsub.f32 %v1314_v41, %v1330_v36  ;;  %v1332_v49 = vmul.f32 %v1300_v50, %v3299_v17  ;;  %v2496_v59 = vpop.eup %2495  ;;  %v1302_v3 = vmul.f32 %v2494_v55, %v1286_v58  ;;  %v1803_v36 = vld [vmem:[#allocation4 + $0x110] sm:$0xff] }
 0x397   : > { %1519 = vperm.xlu0 %2467, %v1341_v26   ;;  %v1345_v53 = vsub.f32 %v1313_v44, %v1329_v40  ;;  %v1331_v52 = vmul.f32 %v1299_v54, %v3305_v22  ;;  %v1301_v0 = vmul.f32 %v2496_v59, %v1285_v62  ;;  %v1288_v22 = vld [vmem:[#allocation13 + $0x78] sm:$0xff]  ;;  %v1319_v26 = vld [vmem:[#allocation14 + $0x70] sm:$0xff]  ;;  %v1368_v44 = vld [vmem:[#allocation4 + $0x78] sm:$0xff] }
 0x398   : > { %v1348_v57 = vsub.f32 %v1316_v56, %v1332_v49  ;;  %v1334_v2 = vmul.f32 %v1302_v3, %v3315_v47  ;;  %v1357_v49 = vld [vmem:[#allocation4 + $0x20] sm:$0xff]  ;;  %v1358_v59 = vld [vmem:[#allocation4 + $0x28] sm:$0xff] }
 0x399   : > { %v1347_v63 = vsub.f32 %v1315_v61, %v1331_v52  ;;  %v1333_v19 = vmul.f32 %v1301_v0, %v3313_v45  ;;  %v1805_v61 = vld [vmem:[#allocation4 + $0x120] sm:$0xff]  ;;  %v1806_v62 = vld [vmem:[#allocation4 + $0x128] sm:$0xff] }
 0x39a   : > { %1534 = vperm.xlu1 %2468, %v1344_v20   ;;  %v2498_v17 = vpop.eup %2497  ;;  %v1350_v10 = vsub.f32 %v1318_v5, %v1334_v2 }
 0x39b   : > { %1529 = vperm.xlu0 %2467, %v1343_v38   ;;  %v2500_v6 = vpop.eup %2499  ;;  %v1304_v11 = vmul.f32 %v2498_v17, %v1288_v22  ;;  %v1349_v14 = vsub.f32 %v1317_v8, %v1333_v19  ;;  %v1361_v17 = vld [vmem:[#allocation4 + $0x40] sm:$0xff]  ;;  %v1362_v8 = vld [vmem:[#allocation4 + $0x48] sm:$0xff] }
 0x39c   : > { %v1303_v15 = vmul.f32 %v2500_v6, %v1287_v9  ;;  %v1809_v9 = vld [vmem:[#allocation4 + $0x140] sm:$0xff] }
 0x39d   : > { %v1336_v4 = vmul.f32 %v1304_v11, %v3326_v12  ;;  %v1808_v12 = vld [vmem:[#allocation4 + $0x138] sm:$0xff] }
 0x39e   : > { %1432 = vperm.xlu1 %2468, %v1298_v32   ;;  %v1335_v47 = vmul.f32 %v1303_v15, %v3330_v1  ;;  %v1801_v1 = vld [vmem:[#allocation4 + $0x100] sm:$0xff]  ;;  %v1364_v32 = vld [vmem:[#allocation4 + $0x58] sm:$0xff] }
 0x39f   : > { %1427 = vperm.xlu0 %2467, %v1297_v34   ;;  %v1352_v45 = vsub.f32 %v1320_v16, %v1336_v4  ;;  %v1355_v34 = vld [vmem:[#allocation4 + $0x10] sm:$0xff] }
 0x3a0   : > { %v1351_v18 = vsub.f32 %v1319_v26, %v1335_v47 }
 0x3a2   : > { %1544 = vperm.xlu1 %2468, %v1346_v48  }
 0x3a3   : > { %1539 = vperm.xlu0 %2467, %v1345_v53   ;;  %v1816_v53 = vld [vmem:[#allocation4 + $0x178] sm:$0xff] }
 0x3a6   : > { %1442 = vperm.xlu1 %2468, %v1300_v50  }
 0x3a7   : > { %1437 = vperm.xlu0 %2467, %v1299_v54  }
 0x3aa   : > { %1554 = vperm.xlu1 %2468, %v1348_v57  }
 0x3ab   : > { %1549 = vperm.xlu0 %2467, %v1347_v63  }
 0x3ae   : > { %1452 = vperm.xlu1 %2468, %v1302_v3  }
 0x3af   : > { %1447 = vperm.xlu0 %2467, %v1301_v0  }
 0x3b2   : > { %1564 = vperm.xlu1 %2468, %v1350_v10   ;;  %v1810_v10 = vld [vmem:[#allocation4 + $0x148] sm:$0xff] }
 0x3b3   : > { %1559 = vperm.xlu0 %2467, %v1349_v14  }
 0x3b6   : > { %1462 = vperm.xlu1 %2468, %v1304_v11  }
 0x3b7   : > { %1457 = vperm.xlu0 %2467, %v1303_v15  }
 0x3ba   : > { %1574 = vperm.xlu1 %2468, %v1352_v45  }
 0x3bb   : > { %1569 = vperm.xlu0 %2467, %v1351_v18   ;;  %v1365_v18 = vld [vmem:[#allocation4 + $0x60] sm:$0xff] }
 0x3fd   : > { %v1403_v23 = vpop.permute.xlu1 %1402 }
 0x3fe   : > { %v1388_v24 = vpop.permute.xlu0 %1387  ;;  %v3345_v37 = vmul.f32 %v1403_v23, %v1359_v25  ;;  %v3347_v39 = vmul.f32 %v1403_v23, %v1360_v27  ;;  %v3349_v40 = vmul.f32 %v1807_v28, %v1403_v23  ;;  %v3351_v41 = vmul.f32 %v1808_v12, %v1403_v23  ;;  %v1366_v12 = vld [vmem:[#allocation4 + $0x68] sm:$0xff] }
 0x3ff   : > { %v1465_v46 = vmul.f32 %v1388_v24, %v1353_v29  ;;  %v1466_v7 = vmul.f32 %v1388_v24, %v1354_v30  ;;  %v1833_v48 = vmul.f32 %v1801_v1, %v1388_v24  ;;  %v1834_v50 = vmul.f32 %v1802_v31, %v1388_v24  ;;  %v1813_v29 = vld [vmem:[#allocation4 + $0x160] sm:$0xff]  ;;  %v1814_v30 = vld [vmem:[#allocation4 + $0x168] sm:$0xff] }
 0x401   : > { %v1413_v20 = vpop.permute.xlu1 %1412 }
 0x402   : > { %v1393_v38 = vpop.permute.xlu0 %1392  ;;  %v3353_v55 = vmul.f32 %v1413_v20, %v1363_v13  ;;  %v3355_v52 = vmul.f32 %v1413_v20, %v1364_v32  ;;  %v3357_v56 = vmul.f32 %v1811_v60, %v1413_v20  ;;  %v3359_v58 = vmul.f32 %v1812_v33, %v1413_v20 }
 0x403   : > { %v1467_v3 = vmul.f32 %v1393_v38, %v1355_v34  ;;  %v1468_v63 = vmul.f32 %v1393_v38, %v1356_v35  ;;  %v1835_v0 = vmul.f32 %v1803_v36, %v1393_v38  ;;  %v1836_v2 = vmul.f32 %v1804_v42, %v1393_v38 }
 0x405   : > { %v1423_v54 = vpop.permute.xlu1 %1422 }
 0x406   : > { %v1398_v57 = vpop.permute.xlu0 %1397  ;;  %v3361_v19 = vmul.f32 %v1423_v54, %v1367_v43  ;;  %v3363_v5 = vmul.f32 %v1423_v54, %v1368_v44  ;;  %v3365_v22 = vmul.f32 %v1815_v51, %v1423_v54  ;;  %v3367_v6 = vmul.f32 %v1816_v53, %v1423_v54 }
 0x407   : > { %v1469_v11 = vmul.f32 %v1398_v57, %v1357_v49  ;;  %v1470_v14 = vmul.f32 %v1398_v57, %v1358_v59  ;;  %v1837_v15 = vmul.f32 %v1805_v61, %v1398_v57  ;;  %v1838_v4 = vmul.f32 %v1806_v62, %v1398_v57 }
 0x409   : > { %v1500_v47 = vpop.permute.xlu1 %1499 }
 0x40a   : > { %v1408_v16 = vpop.permute.xlu0 %1407  ;;  %v1577_v26 = vadd.f32 %v1500_v47, %v1465_v46  ;;  %v1865_v45 = vadd.f32 %v1833_v48, %v1500_v47  ;;  %v1578_v21 = vadd.f32 %v1500_v47, %v1466_v7  ;;  %v1866_v23 = vadd.f32 %v1834_v50, %v1500_v47 }
 0x40b   : > { %v1473_v24 = vmul.f32 %v1408_v16, %v1361_v17  ;;  %v1474_v25 = vmul.f32 %v1408_v16, %v1362_v8  ;;  %v1841_v27 = vmul.f32 %v1809_v9, %v1408_v16  ;;  %v1842_v28 = vmul.f32 %v1810_v10, %v1408_v16 }
 0x40c   : > { %vm1610_vm5 = vcmp.ge.f32.partialorder %v1578_v21, 0.0  ;;  %v1642_v1 = vmul.f32 0.2, %v1578_v21  ;;  %vm1898_vm6 = vcmp.ge.f32.partialorder %v1866_v23, 0.0  ;;  %v1930_v31 = vmul.f32 0.2, %v1866_v23 }
 0x40d   : > { %v1505_v13 = vpop.permute.xlu1 %1504  ;;  %vm1609_vm7 = vcmp.ge.f32.partialorder %v1577_v26, 0.0  ;;  %v1641_v20 = vmul.f32 0.2, %v1577_v26  ;;  %vm1897_vm8 = vcmp.ge.f32.partialorder %v1865_v45, 0.0  ;;  %v1929_v32 = vmul.f32 0.2, %v1865_v45 }
 0x40e   : > { %v1418_v60 = vpop.permute.xlu0 %1417  ;;  %v1579_v33 = vadd.f32 %v1505_v13, %v1467_v3  ;;  %v1867_v38 = vadd.f32 %v1835_v0, %v1505_v13  ;;  %v1580_v34 = vadd.f32 %v1505_v13, %v1468_v63  ;;  %v1674_v35 = vsel %vm1610_vm5, %v1578_v21, %v1642_v1 }
 0x40f   : > { %v1477_v36 = vmul.f32 %v1418_v60, %v1365_v18  ;;  %v1478_v42 = vmul.f32 %v1418_v60, %v1366_v12  ;;  %v1845_v43 = vmul.f32 %v1813_v29, %v1418_v60  ;;  %v1846_v44 = vmul.f32 %v1814_v30, %v1418_v60 }
 0x410   : > { %vm1612_vm9 = vcmp.ge.f32.partialorder %v1580_v34, 0.0  ;;  %v1644_v46 = vmul.f32 0.2, %v1580_v34  ;;  %v1868_v7 = vadd.f32 %v1836_v2, %v1505_v13  ;;  %v1962_v48 = vsel %vm1898_vm6, %v1866_v23, %v1930_v31 }
 0x411   : > { %v1515_v50 = vpop.permute.xlu1 %1514  ;;  %vm1611_vm10 = vcmp.ge.f32.partialorder %v1579_v33, 0.0  ;;  %v1643_v51 = vmul.f32 0.2, %v1579_v33  ;;  %v1673_v53 = vsel %vm1609_vm7, %v1577_v26, %v1641_v20  ;;  %vm1899_vm11 = vcmp.ge.f32.partialorder %v1867_v38, 0.0 }
 0x412   : > { %v1510_v54 = vpop.permute.xlu0 %1509  ;;  %v3372_v49 = vadd.f32 %v1515_v50, %v3345_v37  ;;  %v1584_v59 = vadd.f32 %v1515_v50, %v3347_v39  ;;  %v3376_v61 = vadd.f32 %v3349_v40, %v1515_v50  ;;  %v1872_v62 = vadd.f32 %v3351_v41, %v1515_v50 }
 0x413   : > { %v3379_v57 = vadd.f32 %v1510_v54, %v1469_v11  ;;  %v1582_v3 = vadd.f32 %v1510_v54, %v1470_v14  ;;  %v3381_v63 = vadd.f32 %v1837_v15, %v1510_v54  ;;  %v1870_v0 = vadd.f32 %v1838_v4, %v1510_v54 }
 0x414   : > { %v1676_v2 = vsel %vm1612_vm9, %v1580_v34, %v1644_v46  ;;  %vm1900_vm12 = vcmp.ge.f32.partialorder %v1868_v7, 0.0  ;;  %v1932_v17 = vmul.f32 0.2, %v1868_v7  ;;  %v1675_v37 = vsel %vm1611_vm10, %v1579_v33, %v1643_v51  ;;  %v1369_v34 = vld [vmem:[#allocation4 + $0x80] sm:$0xff] }
 0x415   : > { %v2275_v8 = vpack.c.bf16 %v1676_v2, %v1674_v35  ;;  %v1525_v9 = vpop.permute.xlu1 %1524  ;;  %v2277_v39 = vpack.c.bf16 %v1675_v37, %v1673_v53  ;;  %v1931_v10 = vmul.f32 0.2, %v1867_v38  ;;  %v1961_v40 = vsel %vm1897_vm8, %v1865_v45, %v1929_v32  ;;  %v1370_v35 = vld [vmem:[#allocation4 + $0x88] sm:$0xff]  ;;  %v1372_v2 = vld [vmem:[#allocation4 + $0x98] sm:$0xff] }
 0x416   : > { %v1520_v47 = vpop.permute.xlu0 %1519  ;;  %v1964_v41 = vsel %vm1900_vm12, %v1868_v7, %v1932_v17  ;;  %v3387_v11 = vadd.f32 %v1525_v9, %v3353_v55  ;;  %v3390_v14 = vadd.f32 %v1525_v9, %v3355_v52  ;;  %v3393_v15 = vadd.f32 %v3357_v56, %v1525_v9  ;;  %v1819_v17 = vld [vmem:[#allocation4 + $0x190] sm:$0xff] }
 0x417   : > { %v3395_v4 = vadd.f32 %v1520_v47, %v1473_v24  ;;  %v3397_v16 = vadd.f32 %v1520_v47, %v1474_v25  ;;  %v3399_v26 = vadd.f32 %v1841_v27, %v1520_v47  ;;  %v3401_v18 = vadd.f32 %v1842_v28, %v1520_v47  ;;  %2276 = vmatprep.subr.bf16.mxu0 %v2275_v8 }
 0x418   : > { %v2307_v45 = vpack.c.bf16 %v1964_v41, %v1962_v48  ;;  %v3404_v21 = vadd.f32 %v3359_v58, %v1525_v9  ;;  %2278 = vmatpush1.bf16.msra.mxu0 %v2277_v39  ;;  %v1963_v55 = vsel %vm1899_vm11, %v1867_v38, %v1931_v10  ;;  %vm1614_vm13 = vcmp.ge.f32.partialorder %v1582_v3, 0.0  ;;  %v1820_v9 = vld [vmem:[#allocation4 + $0x198] sm:$0xff] }
 0x419   : > { %v2309_v52 = vpack.c.bf16 %v1963_v55, %v1961_v40  ;;  %vm1616_vm14 = vcmp.ge.f32.partialorder %v1584_v59, 0.0  ;;  %v1646_v56 = vmul.f32 0.2, %v1582_v3  ;;  %v1648_v23 = vmul.f32 0.2, %v1584_v59  ;;  %v1535_v28 = vpop.permute.xlu1 %1534 }
 0x41a   : > { %2308 = vmatprep.subr.bf16.mxu1 %v2307_v45  ;;  %v1530_v24 = vpop.permute.xlu0 %1529  ;;  %vm1902_vm15 = vcmp.ge.f32.partialorder %v1870_v0, 0.0  ;;  %vm1904_vm0 = vcmp.ge.f32.partialorder %v1872_v62, 0.0  ;;  %v1934_v25 = vmul.f32 0.2, %v1870_v0  ;;  %v1936_v27 = vmul.f32 0.2, %v1872_v62 }
 0x41b   : > { %2310 = vmatpush1.bf16.msra.mxu1 %v2309_v52  ;;  %v3407_v12 = vadd.f32 %v1530_v24, %v1477_v36  ;;  %v3409_v58 = vadd.f32 %v1530_v24, %v1478_v42  ;;  %v3411_v29 = vadd.f32 %v1845_v43, %v1530_v24  ;;  %v3413_v30 = vadd.f32 %v1846_v44, %v1530_v24  ;;  %v1817_v43 = vld [vmem:[#allocation4 + $0x180] sm:$0xff]  ;;  %v1818_v44 = vld [vmem:[#allocation4 + $0x188] sm:$0xff] }
 0x41c   : > { %v1678_v1 = vsel %vm1614_vm13, %v1582_v3, %v1646_v56  ;;  %v1680_v31 = vsel %vm1616_vm14, %v1584_v59, %v1648_v23  ;;  %v1966_v13 = vsel %vm1902_vm15, %v1870_v0, %v1934_v25  ;;  %v1968_v20 = vsel %vm1904_vm0, %v1872_v62, %v1936_v27  ;;  %v1371_v0 = vld [vmem:[#allocation4 + $0x90] sm:$0xff] }
 0x41d   : > { %v2279_v32 = vpack.c.bf16 %v1680_v31, %v1678_v1  ;;  %v2311_v60 = vpack.c.bf16 %v1968_v20, %v1966_v13  ;;  %v3418_v33 = vadd.f32 %v1535_v28, %v3361_v19  ;;  %v3421_v38 = vadd.f32 %v1535_v28, %v3363_v5  ;;  %v1433_v37 = vpop.permute.xlu1 %1432 }
 0x41e   : > { %v3424_v36 = vadd.f32 %v3365_v22, %v1535_v28  ;;  %v3427_v42 = vadd.f32 %v3367_v6, %v1535_v28  ;;  %vm1613_vm1 = vcmp.ge.f32.partialorder %v3379_v57, 0.0  ;;  %vm1615_vm2 = vcmp.ge.f32.partialorder %v3372_v49, 0.0  ;;  %v1428_v46 = vpop.permute.xlu0 %1427 }
 0x41f   : > { %2280 = vmatprep.subr.bf16.mxu0 %v2279_v32  ;;  %2312 = vmatprep.subr.bf16.mxu1 %v2311_v60  ;;  %v1645_v19 = vmul.f32 0.2, %v3379_v57  ;;  %v1647_v5 = vmul.f32 0.2, %v3372_v49  ;;  %vm1901_vm3 = vcmp.ge.f32.partialorder %v3381_v63, 0.0  ;;  %vm1903_vm4 = vcmp.ge.f32.partialorder %v3376_v61, 0.0 }
 0x420   : > { %v1933_v22 = vmul.f32 0.2, %v3381_v63  ;;  %v1935_v6 = vmul.f32 0.2, %v3376_v61  ;;  %v1481_v7 = vmul.f32 %v1428_v46, %v1369_v34  ;;  %v1482_v48 = vmul.f32 %v1428_v46, %v1370_v35 }
 0x421   : > { %v1677_v50 = vsel %vm1613_vm1, %v3379_v57, %v1645_v19  ;;  %v1679_v51 = vsel %vm1615_vm2, %v3372_v49, %v1647_v5  ;;  %v1849_v53 = vmul.f32 %v1817_v43, %v1428_v46  ;;  %v1850_v54 = vmul.f32 %v1818_v44, %v1428_v46  ;;  %v1545_v28 = vpop.permute.xlu1 %1544 }
 0x422   : > { %v2281_v59 = vpack.c.bf16 %v1679_v51, %v1677_v50  ;;  %v1965_v62 = vsel %vm1901_vm3, %v3381_v63, %v1933_v22  ;;  %v1967_v3 = vsel %vm1903_vm4, %v3376_v61, %v1935_v6  ;;  %vm1618_vm5 = vcmp.ge.f32.partialorder %v3397_v16, 0.0  ;;  %v1540_v39 = vpop.permute.xlu0 %1539  ;;  %v1373_v50 = vld [vmem:[#allocation4 + $0xa0] sm:$0xff]  ;;  %v1374_v51 = vld [vmem:[#allocation4 + $0xa8] sm:$0xff] }
 0x423   : > { %v2313_v8 = vpack.c.bf16 %v1967_v3, %v1965_v62  ;;  %vm1620_vm6 = vcmp.ge.f32.partialorder %v3390_v14, 0.0  ;;  %v1650_v57 = vmul.f32 0.2, %v3397_v16  ;;  %v1652_v49 = vmul.f32 0.2, %v3390_v14 }
 0x424   : > { %2282 = vmatpush1.bf16.msra.mxu0 %v2281_v59  ;;  %vm1906_vm7 = vcmp.ge.f32.partialorder %v3401_v18, 0.0  ;;  %vm1908_vm8 = vcmp.ge.f32.partialorder %v3404_v21, 0.0  ;;  %v1938_v61 = vmul.f32 0.2, %v3401_v18  ;;  %v1940_v63 = vmul.f32 0.2, %v3404_v21 }
 0x425   : > { %2314 = vmatpush1.bf16.msra.mxu1 %v2313_v8  ;;  %v1682_v10 = vsel %vm1618_vm5, %v3397_v16, %v1650_v57  ;;  %v1684_v40 = vsel %vm1620_vm6, %v3390_v14, %v1652_v49  ;;  %v1483_v47 = vmul.f32 %v1433_v37, %v1371_v0  ;;  %v1484_v41 = vmul.f32 %v1433_v37, %v1372_v2  ;;  %v1376_v0 = vld [vmem:[#allocation4 + $0xb8] sm:$0xff]  ;;  %v1823_v57 = vld [vmem:[#allocation4 + $0x1b0] sm:$0xff] }
 0x426   : > { %v2283_v45 = vpack.c.bf16 %v1684_v40, %v1682_v10  ;;  %v1970_v55 = vsel %vm1906_vm7, %v3401_v18, %v1938_v61  ;;  %v1972_v52 = vsel %vm1908_vm8, %v3404_v21, %v1940_v63  ;;  %v1851_v56 = vmul.f32 %v1819_v17, %v1433_v37  ;;  %v1438_v1 = vpop.permute.xlu0 %1437  ;;  %v1824_v49 = vld [vmem:[#allocation4 + $0x1b8] sm:$0xff] }
 0x427   : > { %v2315_v23 = vpack.c.bf16 %v1972_v52, %v1970_v55  ;;  %v1852_v24 = vmul.f32 %v1820_v9, %v1433_v37  ;;  %vm1617_vm9 = vcmp.ge.f32.partialorder %v3395_v4, 0.0  ;;  %vm1619_vm10 = vcmp.ge.f32.partialorder %v3387_v11, 0.0 }
 0x428   : > { %2284 = vmatprep.subr.bf16.mxu0 %v2283_v45  ;;  %v1649_v25 = vmul.f32 0.2, %v3395_v4  ;;  %v1651_v16 = vmul.f32 0.2, %v3387_v11  ;;  %vm1905_vm11 = vcmp.ge.f32.partialorder %v3399_v26, 0.0  ;;  %vm1907_vm12 = vcmp.ge.f32.partialorder %v3393_v15, 0.0 }
 0x429   : > { %2316 = vmatprep.subr.bf16.mxu1 %v2315_v23  ;;  %v1937_v14 = vmul.f32 0.2, %v3399_v26  ;;  %v1939_v18 = vmul.f32 0.2, %v3393_v15  ;;  %v3463_v21 = vadd.f32 %v1540_v39, %v1481_v7  ;;  %v3465_v27 = vadd.f32 %v1540_v39, %v1482_v48 }
 0x42a   : > { %v1681_v31 = vsel %vm1617_vm9, %v3395_v4, %v1649_v25  ;;  %v1683_v13 = vsel %vm1619_vm10, %v3387_v11, %v1651_v16  ;;  %v3469_v20 = vadd.f32 %v1849_v53, %v1540_v39  ;;  %v3471_v32 = vadd.f32 %v1850_v54, %v1540_v39  ;;  %v1821_v53 = vld [vmem:[#allocation4 + $0x1a0] sm:$0xff]  ;;  %v1443_v54 = vpop.permute.xlu1 %1442  ;;  %v1550_v59 = vpop.permute.xlu0 %1549 }
 0x42b   : > { %v2285_v60 = vpack.c.bf16 %v1683_v13, %v1681_v31  ;;  %v1969_v34 = vsel %vm1905_vm11, %v3399_v26, %v1937_v14  ;;  %v1971_v35 = vsel %vm1907_vm12, %v3393_v15, %v1939_v18  ;;  %vm1622_vm13 = vcmp.ge.f32.partialorder %v3409_v58, 0.0 }
 0x42c   : > { %v2317_v43 = vpack.c.bf16 %v1971_v35, %v1969_v34  ;;  %vm1624_vm14 = vcmp.ge.f32.partialorder %v3421_v38, 0.0  ;;  %v1654_v44 = vmul.f32 0.2, %v3409_v58  ;;  %v1656_v4 = vmul.f32 0.2, %v3421_v38 }
 0x42d   : > { %2286 = vmatpush1.bf16.msra.mxu0 %v2285_v60  ;;  %vm1910_vm15 = vcmp.ge.f32.partialorder %v3413_v30, 0.0  ;;  %vm1912_vm0 = vcmp.ge.f32.partialorder %v3427_v42, 0.0  ;;  %v1942_v11 = vmul.f32 0.2, %v3413_v30  ;;  %v1944_v26 = vmul.f32 0.2, %v3427_v42 }
 0x42e   : > { %2318 = vmatpush1.bf16.msra.mxu1 %v2317_v43  ;;  %v1686_v15 = vsel %vm1622_vm13, %v3409_v58, %v1654_v44  ;;  %v1688_v46 = vsel %vm1624_vm14, %v3421_v38, %v1656_v4  ;;  %v3485_v19 = vadd.f32 %v1545_v28, %v1483_v47  ;;  %v1596_v5 = vadd.f32 %v1545_v28, %v1484_v41  ;;  %v1822_v58 = vld [vmem:[#allocation4 + $0x1a8] sm:$0xff]  ;;  %v1375_v38 = vld [vmem:[#allocation4 + $0xb0] sm:$0xff]  ;;  %v1555_v23 = vpop.permute.xlu1 %1554  ;;  %v1377_v44 = vld [vmem:[#allocation4 + $0xc0] sm:$0xff] }
 0x42f   : > { %v2287_v22 = vpack.c.bf16 %v1688_v46, %v1686_v15  ;;  %v1974_v6 = vsel %vm1910_vm15, %v3413_v30, %v1942_v11  ;;  %v1976_v7 = vsel %vm1912_vm0, %v3427_v42, %v1944_v26  ;;  %v3489_v48 = vadd.f32 %v1851_v56, %v1545_v28  ;;  %v1378_v4 = vld [vmem:[#allocation4 + $0xc8] sm:$0xff]  ;;  %v1825_v11 = vld [vmem:[#allocation4 + $0x1c0] sm:$0xff]  ;;  %v1379_v46 = vld [vmem:[#allocation4 + $0xd0] sm:$0xff] }
 0x430   : > { %v2319_v62 = vpack.c.bf16 %v1976_v7, %v1974_v6  ;;  %v1884_v3 = vadd.f32 %v1852_v24, %v1545_v28  ;;  %vm1621_vm1 = vcmp.ge.f32.partialorder %v3407_v12, 0.0  ;;  %vm1623_vm2 = vcmp.ge.f32.partialorder %v3418_v33, 0.0  ;;  %v1448_v24 = vpop.permute.xlu0 %1447 }
 0x431   : > { %2288 = vmatprep.subr.bf16.mxu0 %v2287_v22  ;;  %v1653_v30 = vmul.f32 0.2, %v3407_v12  ;;  %v1655_v42 = vmul.f32 0.2, %v3418_v33  ;;  %vm1909_vm3 = vcmp.ge.f32.partialorder %v3411_v29, 0.0  ;;  %vm1911_vm4 = vcmp.ge.f32.partialorder %v3424_v36, 0.0 }
 0x432   : > { %2320 = vmatprep.subr.bf16.mxu1 %v2319_v62  ;;  %v1941_v2 = vmul.f32 0.2, %v3411_v29  ;;  %v1943_v17 = vmul.f32 0.2, %v3424_v36  ;;  %v1485_v37 = vmul.f32 %v1438_v1, %v1373_v50  ;;  %v1486_v8 = vmul.f32 %v1438_v1, %v1374_v51  ;;  %v1453_v22 = vpop.permute.xlu1 %1452  ;;  %v1828_v62 = vld [vmem:[#allocation4 + $0x1d8] sm:$0xff] }
 0x433   : > { %v1685_v9 = vsel %vm1621_vm1, %v3407_v12, %v1653_v30  ;;  %v1687_v39 = vsel %vm1623_vm2, %v3418_v33, %v1655_v42  ;;  %v1853_v61 = vmul.f32 %v1821_v53, %v1438_v1  ;;  %v1854_v63 = vmul.f32 %v1822_v58, %v1438_v1 }
 0x434   : > { %v2289_v10 = vpack.c.bf16 %v1687_v39, %v1685_v9  ;;  %v1973_v40 = vsel %vm1909_vm3, %v3411_v29, %v1941_v2  ;;  %v1975_v47 = vsel %vm1911_vm4, %v3424_v36, %v1943_v17  ;;  %v1487_v41 = vmul.f32 %v1443_v54, %v1375_v38  ;;  %v1560_v6 = vpop.permute.xlu0 %1559 }
 0x435   : > { %v2321_v45 = vpack.c.bf16 %v1975_v47, %v1973_v40  ;;  %v1488_v55 = vmul.f32 %v1443_v54, %v1376_v0  ;;  %v1855_v52 = vmul.f32 %v1823_v57, %v1443_v54  ;;  %v1856_v56 = vmul.f32 %v1824_v49, %v1443_v54 }
 0x436   : > { %2290 = vmatpush1.bf16.msra.mxu0 %v2289_v10  ;;  %v3507_v12 = vadd.f32 %v1550_v59, %v1485_v37  ;;  %v3509_v25 = vadd.f32 %v1550_v59, %v1486_v8  ;;  %v3511_v33 = vadd.f32 %v1853_v61, %v1550_v59  ;;  %v3513_v16 = vadd.f32 %v1854_v63, %v1550_v59  ;;  %v1827_v59 = vld [vmem:[#allocation4 + $0x1d0] sm:$0xff]  ;;  %v1565_v61 = vpop.permute.xlu1 %1564 }
 0x437   : > { %2322 = vmatpush1.bf16.msra.mxu1 %v2321_v45  ;;  %vm1626_vm5 = vcmp.ge.f32.partialorder %v3465_v27, 0.0  ;;  %vm1628_vm6 = vcmp.ge.f32.partialorder %v1596_v5, 0.0  ;;  %v1658_v29 = vmul.f32 0.2, %v3465_v27  ;;  %v1660_v36 = vmul.f32 0.2, %v1596_v5 }
 0x438   : > { %vm1914_vm7 = vcmp.ge.f32.partialorder %v3471_v32, 0.0  ;;  %vm1916_vm8 = vcmp.ge.f32.partialorder %v1884_v3, 0.0  ;;  %v1946_v14 = vmul.f32 0.2, %v3471_v32  ;;  %v1948_v18 = vmul.f32 0.2, %v1884_v3  ;;  %v1458_v63 = vpop.permute.xlu0 %1457 }
 0x439   : > { %v1690_v28 = vsel %vm1626_vm5, %v3465_v27, %v1658_v29  ;;  %v1692_v1 = vsel %vm1628_vm6, %v1596_v5, %v1660_v36  ;;  %v3520_v31 = vadd.f32 %v1555_v23, %v1487_v41  ;;  %v1600_v13 = vadd.f32 %v1555_v23, %v1488_v55  ;;  %v1826_v27 = vld [vmem:[#allocation4 + $0x1c8] sm:$0xff]  ;;  %v1380_v5 = vld [vmem:[#allocation4 + $0xd8] sm:$0xff]  ;;  %v1381_v29 = vld [vmem:[#allocation4 + $0xe0] sm:$0xff] }
 0x43a   : > { %v2291_v60 = vpack.c.bf16 %v1692_v1, %v1690_v28  ;;  %v1978_v34 = vsel %vm1914_vm7, %v3471_v32, %v1946_v14  ;;  %v1980_v35 = vsel %vm1916_vm8, %v1884_v3, %v1948_v18  ;;  %v3523_v43 = vadd.f32 %v1855_v52, %v1555_v23  ;;  %v1382_v36 = vld [vmem:[#allocation4 + $0xe8] sm:$0xff]  ;;  %v1829_v28 = vld [vmem:[#allocation4 + $0x1e0] sm:$0xff] }
 0x43b   : > { %v2323_v26 = vpack.c.bf16 %v1980_v35, %v1978_v34  ;;  %v1888_v15 = vadd.f32 %v1856_v56, %v1555_v23  ;;  %vm1625_vm9 = vcmp.ge.f32.partialorder %v3463_v21, 0.0  ;;  %vm1627_vm10 = vcmp.ge.f32.partialorder %v3485_v19, 0.0 }
 0x43c   : > { %2292 = vmatprep.subr.bf16.mxu0 %v2291_v60  ;;  %v1657_v32 = vmul.f32 0.2, %v3463_v21  ;;  %v1659_v7 = vmul.f32 0.2, %v3485_v19  ;;  %vm1913_vm11 = vcmp.ge.f32.partialorder %v3469_v20, 0.0  ;;  %vm1915_vm12 = vcmp.ge.f32.partialorder %v3489_v48, 0.0  ;;  %v1570_v60 = vpop.permute.xlu0 %1569 }
 0x43d   : > { %2324 = vmatprep.subr.bf16.mxu1 %v2323_v26  ;;  %v1945_v50 = vmul.f32 0.2, %v3469_v20  ;;  %v1947_v51 = vmul.f32 0.2, %v3489_v48  ;;  %v1489_v53 = vmul.f32 %v1448_v24, %v1377_v44  ;;  %v1490_v54 = vmul.f32 %v1448_v24, %v1378_v4 }
 0x43e   : > { %v1689_v3 = vsel %vm1625_vm9, %v3463_v21, %v1657_v32  ;;  %v1691_v58 = vsel %vm1627_vm10, %v3485_v19, %v1659_v7  ;;  %v1857_v38 = vmul.f32 %v1825_v11, %v1448_v24  ;;  %v1858_v0 = vmul.f32 %v1826_v27, %v1448_v24  ;;  %v1383_v32 = vld [vmem:[#allocation4 + $0xf0] sm:$0xff] }
 0x43f   : > { %v2293_v30 = vpack.c.bf16 %v1691_v58, %v1689_v3  ;;  %v1977_v42 = vsel %vm1913_vm11, %v3469_v20, %v1945_v50  ;;  %v1979_v2 = vsel %vm1915_vm12, %v3489_v48, %v1947_v51  ;;  %v1491_v17 = vmul.f32 %v1453_v22, %v1379_v46 }
 0x440   : > { %v2325_v37 = vpack.c.bf16 %v1979_v2, %v1977_v42  ;;  %v1492_v8 = vmul.f32 %v1453_v22, %v1380_v5  ;;  %v1859_v57 = vmul.f32 %v1827_v59, %v1453_v22  ;;  %v1860_v49 = vmul.f32 %v1828_v62, %v1453_v22  ;;  %v1832_v59 = vld [vmem:[#allocation4 + $0x1f8] sm:$0xff] }
 0x441   : > { %2294 = vmatpush1.bf16.msra.mxu0 %v2293_v30  ;;  %v3541_v9 = vadd.f32 %v1560_v6, %v1489_v53  ;;  %v3543_v21 = vadd.f32 %v1560_v6, %v1490_v54  ;;  %v3545_v39 = vadd.f32 %v1857_v38, %v1560_v6  ;;  %v3547_v19 = vadd.f32 %v1858_v0, %v1560_v6  ;;  %v1831_v54 = vld [vmem:[#allocation4 + $0x1f0] sm:$0xff] }
 0x442   : > { %2326 = vmatpush1.bf16.msra.mxu1 %v2325_v37  ;;  %vm1630_vm13 = vcmp.ge.f32.partialorder %v3509_v25, 0.0  ;;  %vm1632_vm14 = vcmp.ge.f32.partialorder %v1600_v13, 0.0  ;;  %v1662_v20 = vmul.f32 0.2, %v3509_v25  ;;  %v1664_v48 = vmul.f32 0.2, %v1600_v13 }
 0x443   : > { %vm1918_vm15 = vcmp.ge.f32.partialorder %v3513_v16, 0.0  ;;  %vm1920_vm0 = vcmp.ge.f32.partialorder %v1888_v15, 0.0  ;;  %v1950_v10 = vmul.f32 0.2, %v3513_v16  ;;  %v1952_v40 = vmul.f32 0.2, %v1888_v15 }
 0x444   : > { %v1694_v47 = vsel %vm1630_vm13, %v3509_v25, %v1662_v20  ;;  %v1696_v41 = vsel %vm1632_vm14, %v1600_v13, %v1664_v48  ;;  %v3554_v45 = vadd.f32 %v1565_v61, %v1491_v17  ;;  %v1604_v55 = vadd.f32 %v1565_v61, %v1492_v8  ;;  %v1830_v25 = vld [vmem:[#allocation4 + $0x1e8] sm:$0xff] }
 0x445   : > { %v2295_v52 = vpack.c.bf16 %v1696_v41, %v1694_v47  ;;  %v1982_v56 = vsel %vm1918_vm15, %v3513_v16, %v1950_v10  ;;  %v1984_v23 = vsel %vm1920_vm0, %v1888_v15, %v1952_v40  ;;  %v3557_v24 = vadd.f32 %v1859_v57, %v1565_v61  ;;  %v1463_v16 = vpop.permute.xlu1 %1462 }
 0x446   : > { %v2327_v14 = vpack.c.bf16 %v1984_v23, %v1982_v56  ;;  %v1892_v18 = vadd.f32 %v1860_v49, %v1565_v61  ;;  %vm1629_vm1 = vcmp.ge.f32.partialorder %v3507_v12, 0.0  ;;  %vm1631_vm2 = vcmp.ge.f32.partialorder %v3520_v31, 0.0 }
 0x447   : > { %2296 = vmatprep.subr.bf16.mxu0 %v2295_v52  ;;  %v1661_v1 = vmul.f32 0.2, %v3507_v12  ;;  %v1663_v13 = vmul.f32 0.2, %v3520_v31  ;;  %vm1917_vm3 = vcmp.ge.f32.partialorder %v3511_v33, 0.0  ;;  %vm1919_vm4 = vcmp.ge.f32.partialorder %v3523_v43, 0.0 }
 0x448   : > { %2328 = vmatprep.subr.bf16.mxu1 %v2327_v14  ;;  %v1949_v34 = vmul.f32 0.2, %v3511_v33  ;;  %v1951_v35 = vmul.f32 0.2, %v3523_v43  ;;  %v1493_v44 = vmul.f32 %v1458_v63, %v1381_v29  ;;  %v1494_v4 = vmul.f32 %v1458_v63, %v1382_v36 }
 0x449   : > { %v1693_v11 = vsel %vm1629_vm1, %v3507_v12, %v1661_v1  ;;  %v1695_v26 = vsel %vm1631_vm2, %v3520_v31, %v1663_v13  ;;  %v1861_v15 = vmul.f32 %v1829_v28, %v1458_v63  ;;  %v1862_v27 = vmul.f32 %v1830_v25, %v1458_v63  ;;  %v1384_v12 = vld [vmem:[#allocation4 + $0xf8] sm:$0xff]  ;;  %v1575_v38 = vpop.permute.xlu1 %1574 }
 0x44a   : > { %v2297_v46 = vpack.c.bf16 %v1695_v26, %v1693_v11  ;;  %v1981_v5 = vsel %vm1917_vm3, %v3511_v33, %v1949_v34  ;;  %v1983_v22 = vsel %vm1919_vm4, %v3523_v43, %v1951_v35  ;;  %v3575_v6 = vadd.f32 %v1570_v60, %v1493_v44  ;;  %v1705_v26 = vld [vmem:[#allocation16] sm:$0x1] }
 0x44b   : > { %v2329_v7 = vpack.c.bf16 %v1983_v22, %v1981_v5  ;;  %v1606_v50 = vadd.f32 %v1570_v60, %v1494_v4  ;;  %v3577_v51 = vadd.f32 %v1861_v15, %v1570_v60  ;;  %v1894_v53 = vadd.f32 %v1862_v27, %v1570_v60  ;;  %v1993_v15 = vld [vmem:[#allocation16] sm:$0x1] }
 0x44c   : > { %2298 = vmatpush1.bf16.msra.mxu0 %v2297_v46  ;;  %v3580_v31 = vmul.f32 0.2, %v3575_v6  ;;  %vm1634_vm5 = vcmp.ge.f32.partialorder %v3543_v21, 0.0  ;;  %vm1636_vm6 = vcmp.ge.f32.partialorder %v1604_v55, 0.0  ;;  %v1666_v33 = vmul.f32 0.2, %v3543_v21 }
 0x44d   : > { %2330 = vmatpush1.bf16.msra.mxu1 %v2329_v7  ;;  %v1670_v43 = vmul.f32 0.2, %v1606_v50  ;;  %v3585_v62 = vmul.f32 0.2, %v3577_v51  ;;  %v1958_v3 = vmul.f32 0.2, %v1894_v53  ;;  %v1495_v58 = vmul.f32 %v1463_v16, %v1383_v32 }
 0x44e   : > { %v1668_v0 = vmul.f32 0.2, %v1604_v55  ;;  %v1698_v30 = vsel %vm1634_vm5, %v3543_v21, %v1666_v33  ;;  %vm1922_vm7 = vcmp.ge.f32.partialorder %v3547_v19, 0.0  ;;  %vm1924_vm8 = vcmp.ge.f32.partialorder %v1892_v18, 0.0 }
 0x44f   : > { %v1954_v42 = vmul.f32 0.2, %v3547_v19  ;;  %v1956_v2 = vmul.f32 0.2, %v1892_v18  ;;  %v1496_v17 = vmul.f32 %v1463_v16, %v1384_v12  ;;  %v1863_v37 = vmul.f32 %v1831_v54, %v1463_v16 }
 0x450   : > { %v1700_v8 = vsel %vm1636_vm6, %v1604_v55, %v1668_v0  ;;  %v1864_v57 = vmul.f32 %v1832_v59, %v1463_v16  ;;  %v1607_v49 = vadd.f32 %v1575_v38, %v1495_v58  ;;  %vm1633_vm9 = vcmp.ge.f32.partialorder %v3541_v9, 0.0 }
 0x451   : > { %v2299_v61 = vpack.c.bf16 %v1700_v8, %v1698_v30  ;;  %v1986_v63 = vsel %vm1922_vm7, %v3547_v19, %v1954_v42  ;;  %v1988_v20 = vsel %vm1924_vm8, %v1892_v18, %v1956_v2  ;;  %v1608_v48 = vadd.f32 %v1575_v38, %v1496_v17 }
 0x452   : > { %v2331_v21 = vpack.c.bf16 %v1988_v20, %v1986_v63  ;;  %v1671_v10 = vmul.f32 0.2, %v1607_v49  ;;  %v1895_v40 = vadd.f32 %v1863_v37, %v1575_v38  ;;  %v1896_v47 = vadd.f32 %v1864_v57, %v1575_v38 }
 0x453   : > { %2300 = vmatprep.subr.bf16.mxu0 %v2299_v61  ;;  %v1672_v41 = vmul.f32 0.2, %v1608_v48  ;;  %vm1635_vm10 = vcmp.ge.f32.partialorder %v3554_v45, 0.0  ;;  %v1665_v52 = vmul.f32 0.2, %v3541_v9  ;;  %vm1921_vm11 = vcmp.ge.f32.partialorder %v3545_v39, 0.0 }
 0x454   : > { %2332 = vmatprep.subr.bf16.mxu1 %v2331_v21  ;;  %v1959_v55 = vmul.f32 0.2, %v1895_v40  ;;  %v1960_v56 = vmul.f32 0.2, %v1896_v47  ;;  %v1667_v23 = vmul.f32 0.2, %v3554_v45  ;;  %v1783_v5 = vlaneseq }
 0x455   : > { %v1697_v19 = vsel %vm1633_vm9, %v3541_v9, %v1665_v52  ;;  %vm1923_vm12 = vcmp.ge.f32.partialorder %v3557_v24, 0.0  ;;  %v1953_v29 = vmul.f32 0.2, %v3545_v39  ;;  %v1955_v36 = vmul.f32 0.2, %v3557_v24 }
 0x456   : > { %v1699_v14 = vsel %vm1635_vm10, %v3554_v45, %v1667_v23  ;;  %vm1638_vm13 = vcmp.ge.f32.partialorder %v1606_v50, 0.0  ;;  %vm1640_vm14 = vcmp.ge.f32.partialorder %v1608_v48, 0.0  ;;  %vm1926_vm15 = vcmp.ge.f32.partialorder %v1894_v53, 0.0 }
 0x457   : > { %v2301_v18 = vpack.c.bf16 %v1699_v14, %v1697_v19  ;;  %v1985_v28 = vsel %vm1921_vm11, %v3545_v39, %v1953_v29  ;;  %v1987_v25 = vsel %vm1923_vm12, %v3557_v24, %v1955_v36  ;;  %v1702_v1 = vsel %vm1638_vm13, %v1606_v50, %v1670_v43 }
 0x458   : > { %v2333_v13 = vpack.c.bf16 %v1987_v25, %v1985_v28  ;;  %v1704_v16 = vsel %vm1640_vm14, %v1608_v48, %v1672_v41  ;;  %vm1928_vm0 = vcmp.ge.f32.partialorder %v1896_v47, 0.0  ;;  %v1990_v9 = vsel %vm1926_vm15, %v1894_v53, %v1958_v3 }
 0x459   : > { %2302 = vmatpush1.bf16.msra.mxu0 %v2301_v18  ;;  %v2303_v60 = vpack.c.bf16 %v1704_v16, %v1702_v1  ;;  %v1992_v34 = vsel %vm1928_vm0, %v1896_v47, %v1960_v56  ;;  %vm1637_vm1 = vcmp.ge.f32.partialorder %v3575_v6, 0.0  ;;  %vm1639_vm2 = vcmp.ge.f32.partialorder %v1607_v49, 0.0 }
 0x45a   : > { %2334 = vmatpush1.bf16.msra.mxu1 %v2333_v13  ;;  %v2335_v45 = vpack.c.bf16 %v1992_v34, %v1990_v9  ;;  %v1701_v35 = vsel %vm1637_vm1, %v3575_v6, %v3580_v31  ;;  %v1703_v44 = vsel %vm1639_vm2, %v1607_v49, %v1671_v10  ;;  %vm1925_vm3 = vcmp.ge.f32.partialorder %v3577_v51, 0.0 }
 0x45b   : > { %2304 = vmatprep.subr.bf16.mxu0 %v2303_v60  ;;  %v2305_v39 = vpack.c.bf16 %v1703_v44, %v1701_v35  ;;  %vm1927_vm4 = vcmp.ge.f32.partialorder %v1895_v40, 0.0  ;;  %v1989_v24 = vsel %vm1925_vm3, %v3577_v51, %v3585_v62  ;;  %v2791_v27 = vmov 1966171168  }
 0x45c   : > { %2336 = vmatprep.subr.bf16.mxu1 %v2335_v45  ;;  %v1991_v4 = vsel %vm1927_vm4, %v1895_v40, %v1959_v55  ;;  %v1781_v46 = vunpack.c.l.s4 %v2791_v27  ;;  %v1784_v6 = vshrl.u32 %v1783_v5, 7  ;;  %vm1797_vm5 = vcmp.lt.s32.totalorder %v1783_v5, 256 }
 0x45d   : > { %2306 = vmatpush1.bf16.msra.mxu0 %v2305_v39  ;;  %v2337_v11 = vpack.c.bf16 %v1991_v4, %v1989_v24 }
 0x45e   : > { %v1782_v22 = vunpack.c.0.s8 %v1781_v46 }
 0x45f   : > { %2338 = vmatpush1.bf16.msra.mxu1 %v2337_v11 }
 0x460   : > { %1771 = vmatmul.mubr.f32.vlgmr.msra.gmra.mrb[0].mxu0 %v1705_v26  ;;  %v1785_v7 = vsub.s32 %v1782_v22, %v1784_v6 }
 0x462   : > { %2059 = vmatmul.mubr.f32.vlgmr.msra.gmra.mrb[0].mxu1 %v1993_v15 }
 0x533   : > { %v1772_v32 = vpop.f32.mrb[0].mxu0 }
 0x534   : > { %v1774_v50 = vpop.f32.mrb[1].mxu0 }
 0x535   : > { %v2060_v53 = vpop.f32.mrb[0].mxu1  ;;  %v1779_v12 = vcombine.low %v1772_v32, %v1774_v50 }
 0x536   : > { %v2062_v51 = vpop.f32.mrb[1].mxu1 }
 0x537   : > { %v1786_v54 = vrot.slane %v1779_v12, %v1785_v7  ;;  %v2067_v59 = vcombine.low %v2060_v53, %v2062_v51 }
 0x539   : > { %v1793_v31 = vrot.slane %v1786_v54, %v1785_v7  ;;  %v2074_v33 = vrot.slane %v2067_v59, %v1785_v7 }
 0x53b   : > { %1799 = vst.msk [vmem:[#allocation17] sm:$0x3] %vm1797_vm5, %v1793_v31  ;;  %v2081_v43 = vrot.slane %v2074_v33, %v1785_v7 }
 0x53d   : > { %2084 = vst.msk [vmem:[#allocation17 + $0x2] sm:$0x3] %vm1797_vm5, %v2081_v43 }
 0x53e PF: > { %p2413_p9 = scmp.eq.s32.totalorder %s2856_s30, 1  ;;  %s2792_s18 = smov [#allocation17]  }
 0x53f   : > { %s2091_s20 = sshll.u32 %s2792_s18, 4  ;;  %s2092_s20 = int_to_ptr.vmem [resolvable:$true] %s2091_s20 }
 0x540   : > { %s2699_s10 = scalar_lea.vmem %s2092_s20, 64  ;;  %p2706_p1 = scmp.lt.s32.totalorder %s2092_s20, %s2092_s20 }
 0x541   : > { %p2700_p10 = scmp.ne.s32.totalorder %s2092_s20, %s2699_s10  ;;  %p2707_p11 = scmp.lt.s32.totalorder %s2699_s10, %s2699_s10 }
 0x543   : > { %p2701_p12 = pnand %p2700_p10, %p2413_p9  ;;  %p2708_p3 = por %p2707_p11, %p2706_p1 }
 0x545   : > { %p2702_p8 = pneg %p2701_p12 }
 0x547   : > { %p2709_p6 = pnand %p2708_p3, %p2702_p8 }
 0x549   : > { %2712 = shalt.err (!%p2709_p6)
}
 0x54a   : > { %s2713_s21 = scalar_lea.hbm %s3655_s7, 64 }
 0x54b   : > { %p2714_p4 = scmp.ne.s32.totalorder %s3655_s7, %s2713_s21  ;;  %p2719_p2 = scmp.lt.u32.totalorder %s2713_s21, %s3655_s7 }
 0x54d   : > { %p2715_p13 = pnand %p2714_p4, %p2413_p9 }
 0x54f   : > { %p2716_p0 = pneg %p2715_p13 }
 0x551   : > { %p2721_p7 = pnand %p2719_p2, %p2716_p0 }
 0x553   : > { %2724 = shalt.err (!%p2721_p7)
}
 0x554   : > { %s2793_s15 = smov 32   ;;  %s2794_s16 = smov 2  }
 0x555   : > { %2374 = dma.vmem_to_hbm [thread:$0]  (%p2413_p9), %s2092_s20, 64, %s3655_s7, [#allocation7], %s2793_s15, %s2793_s15, %s2794_s16  }
 0x556   : > { %2758 = dma.done.wait (%p2413_p9), [#allocation7], 64  }
 0x557   : > { %2760 = vsyncadd (%p2413_p9), [#allocation7], 4294967232 }
 0x558 PF: > { %p21_p5 = scmp.ge.s32.totalorder %s3025_s19, 4   ;;  %s3672_s24 = smov %s2767_s25 }
 0x559   : > { %s3673_s25 = smov %s2771_s26  ;;  %s3674_s26 = smov %s3037_s13 }
 0x55a   : > { %s3675_s27 = smov %s3025_s19  ;;  %23 = sbr.rel (!%p21_p5) target bundleno = 7 (0x7), region = 120 }
 0x561   :  { %2107 = vsyncpa [#allocation6], 1 }
 0x562   :  { %2109 = vsyncpa [#allocation6 + $0x1], 1 }
 0x563   :  { %2110 = vsyncpa [#allocation9], 1 }
 0x564   :  { %2111 = vsyncpa [#allocation12], 1 }
 0x565   :  { %2112 = vsyncpa [#allocation15], 1 }
 0x566   :  { %2113 = vsyncpa [#allocation7], 1 }
 0x567   :  { %2115 = vsyncpa [#allocation7 + $0x1], 1 }

</bundles_post_ra>
